<compile_context>
chip_gen: v5e
topology: v5e:2x2
jax: 0.10.0
libtpu: 0.0.40
codegen_flags: <defaults>
</compile_context>

<pallas_src>
import functools
import math

import jax
import jax.numpy as jnp
from jax.experimental import pallas as pl
from jax.experimental.pallas import tpu as pltpu

# l0_para = [temp, inter_min, inter_max]  (eval(args.l0_para) in the module)
TEMP = 0.66
INTER_MIN = -0.1
INTER_MAX = 1.1


def _l0_sign_kernel(is_training, n_edges, *refs):
    f32 = jnp.float32
    bf16 = jnp.bfloat16

    if is_training:
        (packed_ref, tgt_ref, drop_ref, unif_ref, batch_ref,
         w1_ref, b1_ref, lpw2_ref, lpb2_ref, sgw2_ref, sgb2_ref, gw_ref, gb_ref,
         out_ref, stats_ref, acc_ref, l0_ref) = refs
    else:
        (packed_ref, tgt_ref, batch_ref,
         w1_ref, b1_ref, lpw2_ref, lpb2_ref, sgw2_ref, sgb2_ref, gw_ref, gb_ref,
         out_ref, stats_ref, acc_ref, l0_ref) = refs
        drop_ref = unif_ref = None

    four_d, TE = packed_ref.shape
    D = four_d // 4
    H = lpw2_ref.shape[0]
    Dp1, N = acc_ref.shape
    C, B = out_ref.shape

    e = pl.program_id(0)

    @pl.when(e == 0)
    def _init():
        acc_ref[...] = jnp.zeros_like(acc_ref)
        l0_ref[...] = jnp.zeros_like(l0_ref)

    # Validity mask (lanes) for the zero-padded tail of the edge dimension.
    valid = (jax.lax.broadcasted_iota(jnp.int32, (1, TE), 1) + e * TE) < n_edges
    valid_f = valid.astype(f32)

    # ---------------- fused first layers (LinkPred + SIGN), feature-major ---------
    pk = packed_ref[...]                                   # [4D, TE] bf16 (se|xi|re|xj)
    prod = pk[:2 * D, :] * pk[2 * D:, :]                   # [2D, TE] = (se*re | xi*xj)
    h = jnp.dot(w1_ref[...], prod, preferred_element_type=f32) + b1_ref[...]  # [2H, TE]
    h = jnp.maximum(h, 0.0)
    h_lp = h[:H, :]                                        # LinkPred hidden  [H, TE]
    h_sg = h[H:, :]                                        # SIGN     hidden  [H, TE]
    if is_training:
        h_lp = h_lp * drop_ref[...].astype(f32)            # Dropout(p=0.5), mask in {0,2}

    # LinkPred linear2 has output width 1 -> sublane reduce, no MXU pass.
    loc = jnp.sum(h_lp * lpw2_ref[...], axis=0, keepdims=True) + lpb2_ref[...]  # [1, TE]

    # ---------------- hard-concrete gate (log2 matches the torch reference) -------
    if is_training:
        u = unif_ref[...]                                  # [1, TE] in (eps, 1-eps)
        s = jax.nn.sigmoid((loc + jnp.log2(u) - jnp.log2(1.0 - u)) / TEMP)
    else:
        s = jax.nn.sigmoid(loc)
    s = s * (INTER_MAX - INTER_MIN) + INTER_MIN
    s = jnp.clip(s, 0.0, 1.0) * valid_f                    # padded edges -> 0
    keep = (s > 0.0).astype(f32)                           # kept-edge flag

    l0_gate = jax.nn.sigmoid(loc - TEMP * math.log2(-INTER_MIN / INTER_MAX))
    l0_ref[...] += jnp.sum(l0_gate * valid_f, keepdims=True)          # (1, 1)

    # ---------------- SIGN message second layer + transposed scatter-add ----------
    # sg_w2_T / sg_b2_T were padded with one extra ROW (w=0, b=1) so row D of `msg`
    # is exactly 1.0; after masking by `keep` it carries the kept-edge indicator,
    # fusing the in-degree count into the same scatter matmul.
    msg = jnp.dot(sgw2_ref[...], h_sg.astype(bf16),
                  preferred_element_type=f32) + sgb2_ref[...]         # [D+1, TE]
    row = jax.lax.broadcasted_iota(jnp.int32, (Dp1, 1), 0)
    msg = msg * jnp.where(row < D, s, keep)                           # [D+1, TE]

    # one-hot scatter matrix, transposed: onehot_T[t, n] = (tgt[t] == n)
    onehot_t = (jax.lax.broadcasted_iota(jnp.int32, (1, N), 1)
                == tgt_ref[...]).astype(bf16)                         # [TE, N]
    acc_ref[...] += jnp.dot(msg.astype(bf16), onehot_t,
                            preferred_element_type=f32)               # [D+1, N]

    # ---------------- finalize: scatter-mean, pool, readout ------------------------
    @pl.when(e == pl.num_programs(0) - 1)
    def _finalize():
        acc = acc_ref[...]
        msg_sum = acc[:D, :]                                          # [D, N]
        cnt = acc[D:, :]                                              # [1, N] kept in-degree
        inv = 1.0 / jnp.maximum(cnt, 1.0)
        updated = msg_sum * inv * (cnt > 0.0).astype(f32)             # scatter-mean [D, N]

        l2 = jnp.sum(updated * updated, keepdims=True)                # (1, 1)
        nkept = jnp.sum(cnt, keepdims=True)                           # (1, 1) total kept edges

        # global mean pool (transposed): pool[n, b] = (batch[n] == b)
        pool = (jax.lax.broadcasted_iota(jnp.int32, (1, B), 1)
                == batch_ref[...]).astype(f32)                        # [N, B]
        gsum = jnp.dot(updated, pool, preferred_element_type=f32)     # [D, B]
        ncnt = jnp.sum(pool, axis=0, keepdims=True)                   # [1, B]
        gemb = gsum * (1.0 / jnp.maximum(ncnt, 1.0)) * (ncnt > 0.0).astype(f32)
        out_ref[...] = jnp.dot(gw_ref[...], gemb,
                               preferred_element_type=f32) + gb_ref[...]   # [2, B]

        lane = jax.lax.broadcasted_iota(jnp.int32, (1, 128), 1)
        l0_mean = l0_ref[...] * (1.0 / n_edges)
        stats_ref[...] = (jnp.where(lane == 0, l0_mean, 0.0)
                          + jnp.where(lane == 1, l2, 0.0)
                          + jnp.where(lane == 2, nkept, 0.0))


def init_params(key, n_feature, dim, hidden):
    """Deterministic parameter init mirroring the module's __init__ shapes."""
    ks = jax.random.split(key, 12)

    def lin(kw, kb, fan_in, fan_out):
        bound = 1.0 / math.sqrt(fan_in)
        w = jax.random.uniform(kw, (fan_in, fan_out), jnp.float32, -bound, bound)
        b = jax.random.uniform(kb, (1, fan_out), jnp.float32, -bound, bound)
        return w, b

    p = {}
    p["feature_emb"] = jax.random.normal(ks[0], (n_feature, dim), jnp.float32)
    # feature_emb_edge.weight ~ N(0.2, 0.01)
    p["feature_emb_edge"] = 0.2 + 0.01 * jax.random.normal(ks[1], (n_feature, dim), jnp.float32)
    p["lp_w1"], p["lp_b1"] = lin(ks[2], ks[3], dim, hidden)
    w2, b2 = lin(ks[4], ks[5], hidden, 1)
    p["lp_w2"], p["lp_b2"] = w2 + 0.2, b2                 # linear2.weight += 0.2
    p["sg_w1"], p["sg_b1"] = lin(ks[6], ks[7], dim, hidden)
    p["sg_w2"], p["sg_b2"] = lin(ks[8], ks[9], hidden, dim)
    p["g_w"], p["g_b"] = lin(ks[10], ks[11], dim, 2)
    return p


def _round_up(a, b):
    return -(-a // b) * b


def l0_sign_forward(params, x, edge_index, edge_attr, batch, num_graphs,
                    is_training=True, rng=None, edge_tile=1024):
    """Returns (out [B,2], l0_penalty scalar, l2_penalty scalar, num_edges int)."""
    N = x.shape[0]
    E = edge_index.shape[1]
    D = params["feature_emb"].shape[1]
    H = params["lp_w1"].shape[1]
    B = num_graphs
    C = params["g_w"].shape[1]

    # Edge tile: multiple of 128 lanes; large default amortizes per-step overhead.
    TE = max(128, min(_round_up(edge_tile, 128), _round_up(E, 128)))
    num_tiles = -(-E // TE)
    E_pad = num_tiles * TE
    pad = E_pad - E

    # ---- host-side glue: embedding gathers, packing, weight re-layout ------------
    node_emb = params["feature_emb"][x[:, 0]]                       # x.squeeze(1) -> [N, D]
    se = params["feature_emb_edge"][edge_attr[:, 0]]                # sender emb   [E, D]
    re = params["feature_emb_edge"][edge_attr[:, 1]]                # receiver emb [E, D]
    xj = node_emb[edge_index[0]]                                    # source nodes [E, D]
    xi = node_emb[edge_index[1]]                                    # target nodes [E, D]

    # Feature-major packed edge stream [4D, E_pad] bf16; top*bottom = (se*re | xi*xj).
    packed = jnp.concatenate([se, xi, re, xj], axis=1).T.astype(jnp.bfloat16)
    packed = jnp.pad(packed, ((0, 0), (0, pad)))

    tgt = jnp.pad(edge_index[1].astype(jnp.int32), (0, pad)).reshape(E_pad, 1)
    batch_col = batch.astype(jnp.int32).reshape(N, 1)

    # Block-diagonal transposed first-layer weight [2H, 2D] (LinkPred | SIGN), bf16 MXU operand.
    w1_bd_T = jnp.zeros((2 * H, 2 * D), jnp.float32)
    w1_bd_T = w1_bd_T.at[:H, :D].set(params["lp_w1"].T)
    w1_bd_T = w1_bd_T.at[H:, D:].set(params["sg_w1"].T)
    w1_bd_T = w1_bd_T.astype(jnp.bfloat16)
    b1_cat = jnp.concatenate([params["lp_b1"].reshape(H, 1),
                              params["sg_b1"].reshape(H, 1)], axis=0)     # [2H, 1]

    lp_w2_col = params["lp_w2"].reshape(H, 1)                             # [H, 1]
    lp_b2 = params["lp_b2"].reshape(1, 1)

    # SIGN second layer, transposed and padded with one extra row (w=0, b=1) for the count.
    sg_w2_T = jnp.concatenate([params["sg_w2"].T, jnp.zeros((1, H), jnp.float32)],
                              axis=0).astype(jnp.bfloat16)                # [D+1, H]
    sg_b2_T = jnp.concatenate([params["sg_b2"].reshape(D, 1),
                               jnp.ones((1, 1), jnp.float32)], axis=0)    # [D+1, 1]

    g_w_T = params["g_w"].T                                               # [C, D]
    g_b_T = params["g_b"].reshape(C, 1)

    in_specs = [
        pl.BlockSpec((4 * D, TE), lambda e: (0, e)),        # packed edge stream
        pl.BlockSpec((TE, 1), lambda e: (e, 0)),            # target node ids (column)
    ]
    args = [packed, tgt]

    if is_training:
        if rng is None:
            rng = jax.random.PRNGKey(0)
        kd, ku = jax.random.split(rng)
        # TODO(synk): on-chip pltpu.prng_* would avoid this HBM traffic but has no
        #             interpret/CPU lowering; randomness is generated host-side instead.
        dmask = (jax.random.bernoulli(kd, 0.5, (H, E_pad)).astype(jnp.float32)
                 * 2.0).astype(jnp.bfloat16)                # Dropout(p=0.5), pre-scaled
        unif = jnp.clip(jax.random.uniform(ku, (1, E_pad), jnp.float32),
                        1e-6, 1.0 - 1e-6)
        in_specs += [pl.BlockSpec((H, TE), lambda e: (0, e)),
                     pl.BlockSpec((1, TE), lambda e: (0, e))]
        args += [dmask, unif]

    const = lambda shape: pl.BlockSpec(shape, lambda e: (0, 0))
    in_specs += [
        const((N, 1)),                                      # batch (graph) ids
        const((2 * H, 2 * D)), const((2 * H, 1)),           # fused W1 (bf16), b1
        const((H, 1)), const((1, 1)),                       # lp_w2 col, lp_b2
        const((D + 1, H)), const((D + 1, 1)),               # sg_w2_T (padded), sg_b2_T
        const((C, D)), const((C, 1)),                       # g_w_T, g_b_T
    ]
    args += [batch_col, w1_bd_T, b1_cat, lp_w2_col, lp_b2, sg_w2_T, sg_b2_T, g_w_T, g_b_T]

    grid_spec = pltpu.PrefetchScalarGridSpec(
        num_scalar_prefetch=0,
        grid=(num_tiles,),
        in_specs=in_specs,
        out_specs=(const((C, B)), const((1, 128))),
        scratch_shapes=[
            pltpu.VMEM((D + 1, N), jnp.float32),   # transposed msg-sum + fused in-degree acc
            pltpu.VMEM((1, 1), jnp.float32),       # l0 partial sum
        ],
    )

    out_t, stats = pl.pallas_call(
        functools.partial(_l0_sign_kernel, is_training, E),
        out_shape=(jax.ShapeDtypeStruct((C, B), jnp.float32),
                   jax.ShapeDtypeStruct((1, 128), jnp.float32)),
        grid_spec=grid_spec,
        compiler_params=pltpu.CompilerParams(
            dimension_semantics=("arbitrary",),     # edge axis reduces into VMEM accumulators
            vmem_limit_bytes=32 * 1024 * 1024),     # safe on v5e/v6e/v7x; raise on v6e if TE grows
    )(*args)

    out = out_t.T                                           # [B, 2]
    l0_penalty = stats[0, 0]
    l2_penalty = stats[0, 1]
    num_edges = stats[0, 2].astype(jnp.int32)
    return out, l0_penalty, l2_penalty, num_edges


if __name__ == "__main__":
    n_feature, dim, hidden = 32, 32, 32
    B = 4
    nodes_per_graph = 8
    N = B * nodes_per_graph
    E = 300                          # with edge_tile=128 -> 3 grid steps + tail padding

    key = jax.random.PRNGKey(0)
    kp, kx, kg, ksrc, kdst, ka, kr = jax.random.split(key, 7)
    params = init_params(kp, n_feature, dim, hidden)

    # data.x: node feature ids [N, 1]
    x = jax.random.randint(kx, (N, 1), 0, n_feature, dtype=jnp.int32)
    # edges stay within their graph (block-diagonal structure)
    egraph = jax.random.randint(kg, (E,), 0, B, dtype=jnp.int32)
    src = egraph * nodes_per_graph + jax.random.randint(ksrc, (E,), 0, nodes_per_graph, dtype=jnp.int32)
    dst = egraph * nodes_per_graph + jax.random.randint(kdst, (E,), 0, nodes_per_graph, dtype=jnp.int32)
    edge_index = jnp.stack([src, dst], axis=0)                     # [2, E]
    # data.edge_attr: per-edge (sender, receiver) feature ids [E, 2]
    edge_attr = jax.random.randint(ka, (E, 2), 0, n_feature, dtype=jnp.int32)
    batch = jnp.repeat(jnp.arange(B, dtype=jnp.int32), nodes_per_graph)       # [N]

    res_train = l0_sign_forward(params, x, edge_index, edge_attr, batch, B,
                                is_training=True, rng=kr, edge_tile=128)
    res_eval = l0_sign_forward(params, x, edge_index, edge_attr, batch, B,
                               is_training=False, edge_tile=128)
    jax.block_until_ready(res_train)
    jax.block_until_ready(res_eval)
    print("KERNEL_OK")
</pallas_src>

<mosaic_0001>
module attributes {stable_mosaic.version = 11 : i64} {
  func.func @_l0_sign_kernel(%arg0: i32, %arg1: memref<128x128xbf16, #tpu.memory_space<vmem>>, %arg2: memref<128x1xi32, #tpu.memory_space<vmem>>, %arg3: memref<32x128xbf16, #tpu.memory_space<vmem>>, %arg4: memref<1x128xf32, #tpu.memory_space<vmem>>, %arg5: memref<32x1xi32, #tpu.memory_space<vmem>>, %arg6: memref<64x64xbf16, #tpu.memory_space<vmem>>, %arg7: memref<64x1xf32, #tpu.memory_space<vmem>>, %arg8: memref<32x1xf32, #tpu.memory_space<vmem>>, %arg9: memref<1x1xf32, #tpu.memory_space<vmem>>, %arg10: memref<33x32xbf16, #tpu.memory_space<vmem>>, %arg11: memref<33x1xf32, #tpu.memory_space<vmem>>, %arg12: memref<2x32xf32, #tpu.memory_space<vmem>>, %arg13: memref<2x1xf32, #tpu.memory_space<vmem>>, %arg14: memref<2x4xf32, #tpu.memory_space<vmem>>, %arg15: memref<1x128xf32, #tpu.memory_space<vmem>>, %arg16: memref<33x32xf32, #tpu.memory_space<vmem>>, %arg17: memref<1x1xf32, #tpu.memory_space<vmem>>) attributes {dimension_semantics = [#tpu.dimension_semantics<arbitrary>], iteration_bounds = array<i64: 3>, scalar_prefetch = 0 : i64, scratch_operands = 2 : i64, tpu.core_type = #tpu.core_type<tc>, window_params = [{transform_indices = @transform_0, window_bounds = array<i64: 128, 128>}, {transform_indices = @transform_1, window_bounds = array<i64: 128, 1>}, {transform_indices = @transform_2, window_bounds = array<i64: 32, 128>}, {transform_indices = @transform_3, window_bounds = array<i64: 1, 128>}, {pipeline_mode = #tpu.pipeline_mode<synchronous>, transform_indices = @transform_4, window_bounds = array<i64: 32, 1>}, {pipeline_mode = #tpu.pipeline_mode<synchronous>, transform_indices = @transform_5, window_bounds = array<i64: 64, 64>}, {pipeline_mode = #tpu.pipeline_mode<synchronous>, transform_indices = @transform_6, window_bounds = array<i64: 64, 1>}, {pipeline_mode = #tpu.pipeline_mode<synchronous>, transform_indices = @transform_7, window_bounds = array<i64: 32, 1>}, {pipeline_mode = #tpu.pipeline_mode<synchronous>, transform_indices = @transform_8, window_bounds = array<i64: 1, 1>}, {pipeline_mode = #tpu.pipeline_mode<synchronous>, transform_indices = @transform_9, window_bounds = array<i64: 33, 32>}, {pipeline_mode = #tpu.pipeline_mode<synchronous>, transform_indices = @transform_10, window_bounds = array<i64: 33, 1>}, {pipeline_mode = #tpu.pipeline_mode<synchronous>, transform_indices = @transform_11, window_bounds = array<i64: 2, 32>}, {pipeline_mode = #tpu.pipeline_mode<synchronous>, transform_indices = @transform_12, window_bounds = array<i64: 2, 1>}, {pipeline_mode = #tpu.pipeline_mode<synchronous>, transform_indices = @transform_13, window_bounds = array<i64: 2, 4>}, {pipeline_mode = #tpu.pipeline_mode<synchronous>, transform_indices = @transform_14, window_bounds = array<i64: 1, 128>}]} {
    %c0_i32 = arith.constant 0 : i32
    %0 = arith.cmpi eq, %arg0, %c0_i32 : i32
    %1 = arith.extui %0 : i1 to i32
    %c0_i32_0 = arith.constant 0 : i32
    %2 = arith.cmpi ne, %1, %c0_i32_0 : i32
    scf.if %2 {
      %cst_46 = arith.constant 0.000000e+00 : f32
      %117 = vector.broadcast %cst_46 : f32 to vector<33x32xf32>
      %c0_47 = arith.constant 0 : index
      %c0_48 = arith.constant 0 : index
      %118 = vector.load %arg16[%c0_47, %c0_48] : memref<33x32xf32, #tpu.memory_space<vmem>>, vector<33x32xf32>
      tpu.vector_store %arg16[%c0_47, %c0_48], %117 {strides = array<i32>} : memref<33x32xf32, #tpu.memory_space<vmem>>, vector<33x32xf32>,
      %cst_49 = arith.constant 0.000000e+00 : f32
      %119 = vector.broadcast %cst_49 : f32 to vector<1x1xf32>
      %c0_50 = arith.constant 0 : index
      %c0_51 = arith.constant 0 : index
      %120 = vector.load %arg17[%c0_50, %c0_51] : memref<1x1xf32, #tpu.memory_space<vmem>>, vector<1x1xf32>
      tpu.vector_store %arg17[%c0_50, %c0_51], %119 {strides = array<i32>} : memref<1x1xf32, #tpu.memory_space<vmem>>, vector<1x1xf32>,
    } else {
    }
    %3 = tpu.iota {dimensions = array<i32: 1>} : vector<1x128xi32>
    %c128_i32 = arith.constant 128 : i32
    %4 = arith.muli %arg0, %c128_i32 : i32
    %5 = vector.broadcast %4 : i32 to vector<1x128xi32>
    %6 = arith.addi %3, %5 : vector<1x128xi32>
    %c300_i32 = arith.constant 300 : i32
    %7 = vector.broadcast %c300_i32 : i32 to vector<1x128xi32>
    %8 = arith.cmpi slt, %6, %7 : vector<1x128xi32>
    %9 = arith.extui %8 : vector<1x128xi1> to vector<1x128xi32>
    %10 = arith.sitofp %9 : vector<1x128xi32> to vector<1x128xf32>
    %c0 = arith.constant 0 : index
    %c0_1 = arith.constant 0 : index
    %11 = vector.load %arg1[%c0, %c0_1] : memref<128x128xbf16, #tpu.memory_space<vmem>>, vector<128x128xbf16>
    %12 = vector.extract_strided_slice %11 {offsets = [0, 0], sizes = [64, 128], strides = [1, 1]} : vector<128x128xbf16> to vector<64x128xbf16>
    %13 = vector.extract_strided_slice %11 {offsets = [64, 0], sizes = [64, 128], strides = [1, 1]} : vector<128x128xbf16> to vector<64x128xbf16>
    %14 = arith.mulf %12, %13 : vector<64x128xbf16>
    %c0_2 = arith.constant 0 : index
    %c0_3 = arith.constant 0 : index
    %15 = vector.load %arg6[%c0_2, %c0_3] : memref<64x64xbf16, #tpu.memory_space<vmem>>, vector<64x64xbf16>
    %cst = arith.constant dense<0.000000e+00> : vector<64x128xf32>
    %16 = tpu.matmul %15, %14, %cst {dimension_numbers = #tpu.dot_dimension_numbers<[1], [0], [0], [1], [0, 0, 1, 1], [], []>} : vector<64x64xbf16>, vector<64x128xbf16>, vector<64x128xf32> -> vector<64x128xf32>
    %c0_4 = arith.constant 0 : index
    %c0_5 = arith.constant 0 : index
    %17 = vector.load %arg7[%c0_4, %c0_5] : memref<64x1xf32, #tpu.memory_space<vmem>>, vector<64x1xf32>
    %18 = vector.broadcast %17 : vector<64x1xf32> to vector<64x128xf32>
    %19 = arith.addf %16, %18 : vector<64x128xf32>
    %cst_6 = arith.constant 0.000000e+00 : f32
    %20 = vector.broadcast %cst_6 : f32 to vector<64x128xf32>
    %21 = arith.maximumf %19, %20 : vector<64x128xf32>
    %22 = vector.extract_strided_slice %21 {offsets = [0, 0], sizes = [32, 128], strides = [1, 1]} : vector<64x128xf32> to vector<32x128xf32>
    %23 = vector.extract_strided_slice %21 {offsets = [32, 0], sizes = [32, 128], strides = [1, 1]} : vector<64x128xf32> to vector<32x128xf32>
    %c0_7 = arith.constant 0 : index
    %c0_8 = arith.constant 0 : index
    %24 = vector.load %arg3[%c0_7, %c0_8] : memref<32x128xbf16, #tpu.memory_space<vmem>>, vector<32x128xbf16>
    %25 = arith.extf %24 : vector<32x128xbf16> to vector<32x128xf32>
    %26 = arith.mulf %22, %25 : vector<32x128xf32>
    %c0_9 = arith.constant 0 : index
    %c0_10 = arith.constant 0 : index
    %27 = vector.load %arg8[%c0_9, %c0_10] : memref<32x1xf32, #tpu.memory_space<vmem>>, vector<32x1xf32>
    %28 = vector.broadcast %27 : vector<32x1xf32> to vector<32x128xf32>
    %29 = arith.mulf %26, %28 : vector<32x128xf32>
    %cst_11 = arith.constant dense<0.000000e+00> : vector<128xf32>
    %30 = vector.multi_reduction <add>, %29, %cst_11 [0] : vector<32x128xf32> to vector<128xf32>
    %31 = vector.shape_cast %30 : vector<128xf32> to vector<1x128xf32>
    %c0_12 = arith.constant 0 : index
    %c0_13 = arith.constant 0 : index
    %32 = vector.load %arg9[%c0_12, %c0_13] : memref<1x1xf32, #tpu.memory_space<vmem>>, vector<1x1xf32>
    %33 = vector.broadcast %32 : vector<1x1xf32> to vector<1x128xf32>
    %34 = arith.addf %31, %33 : vector<1x128xf32>
    %c0_14 = arith.constant 0 : index
    %c0_15 = arith.constant 0 : index
    %35 = vector.load %arg4[%c0_14, %c0_15] : memref<1x128xf32, #tpu.memory_space<vmem>>, vector<1x128xf32>
    %36 = math.log %35 : vector<1x128xf32>
    %cst_16 = arith.constant 2.000000e+00 : f32
    %37 = math.log %cst_16 : f32
    %38 = vector.broadcast %37 : f32 to vector<1x128xf32>
    %39 = arith.divf %36, %38 : vector<1x128xf32>
    %40 = arith.addf %34, %39 : vector<1x128xf32>
    %cst_17 = arith.constant 1.000000e+00 : f32
    %41 = vector.broadcast %cst_17 : f32 to vector<1x128xf32>
    %42 = arith.subf %41, %35 : vector<1x128xf32>
    %43 = math.log %42 : vector<1x128xf32>
    %cst_18 = arith.constant 2.000000e+00 : f32
    %44 = math.log %cst_18 : f32
    %45 = vector.broadcast %44 : f32 to vector<1x128xf32>
    %46 = arith.divf %43, %45 : vector<1x128xf32>
    %47 = arith.subf %40, %46 : vector<1x128xf32>
    %cst_19 = arith.constant 6.600000e-01 : f32
    %48 = vector.broadcast %cst_19 : f32 to vector<1x128xf32>
    %49 = arith.divf %47, %48 : vector<1x128xf32>
    %50 = arith.negf %49 : vector<1x128xf32>
    %51 = math.exp %50 : vector<1x128xf32>
    %cst_20 = arith.constant 1.000000e+00 : f32
    %52 = vector.broadcast %cst_20 : f32 to vector<1x128xf32>
    %53 = arith.addf %52, %51 : vector<1x128xf32>
    %54 = arith.divf %52, %53 : vector<1x128xf32>
    %cst_21 = arith.constant 1.200000e+00 : f32
    %55 = vector.broadcast %cst_21 : f32 to vector<1x128xf32>
    %56 = arith.mulf %54, %55 : vector<1x128xf32>
    %cst_22 = arith.constant -1.000000e-01 : f32
    %57 = vector.broadcast %cst_22 : f32 to vector<1x128xf32>
    %58 = arith.addf %56, %57 : vector<1x128xf32>
    %cst_23 = arith.constant 0.000000e+00 : f32
    %cst_24 = arith.constant 1.000000e+00 : f32
    %59 = vector.broadcast %cst_23 : f32 to vector<1x128xf32>
    %60 = arith.maximumf %59, %58 : vector<1x128xf32>
    %61 = vector.broadcast %cst_24 : f32 to vector<1x128xf32>
    %62 = arith.minimumf %61, %60 : vector<1x128xf32>
    %63 = arith.mulf %62, %10 : vector<1x128xf32>
    %cst_25 = arith.constant 0.000000e+00 : f32
    %64 = vector.broadcast %cst_25 : f32 to vector<1x128xf32>
    %65 = arith.cmpf ogt, %63, %64 : vector<1x128xf32>
    %66 = arith.extui %65 : vector<1x128xi1> to vector<1x128xi32>
    %67 = arith.sitofp %66 : vector<1x128xi32> to vector<1x128xf32>
    %cst_26 = arith.constant -2.28322482 : f32
    %68 = vector.broadcast %cst_26 : f32 to vector<1x128xf32>
    %69 = arith.subf %34, %68 : vector<1x128xf32>
    %70 = arith.negf %69 : vector<1x128xf32>
    %71 = math.exp %70 : vector<1x128xf32>
    %cst_27 = arith.constant 1.000000e+00 : f32
    %72 = vector.broadcast %cst_27 : f32 to vector<1x128xf32>
    %73 = arith.addf %72, %71 : vector<1x128xf32>
    %74 = arith.divf %72, %73 : vector<1x128xf32>
    %c0_28 = arith.constant 0 : index
    %c0_29 = arith.constant 0 : index
    %75 = vector.load %arg17[%c0_28, %c0_29] : memref<1x1xf32, #tpu.memory_space<vmem>>, vector<1x1xf32>
    %76 = arith.mulf %74, %10 : vector<1x128xf32>
    %77 = vector.shape_cast %76 : vector<1x128xf32> to vector<1x1x128xf32>
    %cst_30 = arith.constant dense<0.000000e+00> : vector<1xf32>
    %78 = vector.multi_reduction <add>, %77, %cst_30 [1, 2] : vector<1x1x128xf32> to vector<1xf32>
    %79 = vector.shape_cast %78 : vector<1xf32> to vector<1x1x1xf32>
    %80 = vector.extract %79[0, 0, 0] : f32 from vector<1x1x1xf32>
    %81 = vector.broadcast %80 : f32 to vector<1x1xf32>
    %82 = arith.addf %75, %81 : vector<1x1xf32>
    %c0_31 = arith.constant 0 : index
    %c0_32 = arith.constant 0 : index
    %83 = vector.load %arg17[%c0_31, %c0_32] : memref<1x1xf32, #tpu.memory_space<vmem>>, vector<1x1xf32>
    tpu.vector_store %arg17[%c0_31, %c0_32], %82 {strides = array<i32>} : memref<1x1xf32, #tpu.memory_space<vmem>>, vector<1x1xf32>,
    %c0_33 = arith.constant 0 : index
    %c0_34 = arith.constant 0 : index
    %84 = vector.load %arg10[%c0_33, %c0_34] : memref<33x32xbf16, #tpu.memory_space<vmem>>, vector<33x32xbf16>
    %85 = arith.truncf %23 : vector<32x128xf32> to vector<32x128xbf16>
    %cst_35 = arith.constant dense<0.000000e+00> : vector<33x128xf32>
    %86 = tpu.matmul %84, %85, %cst_35 {dimension_numbers = #tpu.dot_dimension_numbers<[1], [0], [0], [1], [0, 0, 1, 1], [], []>} : vector<33x32xbf16>, vector<32x128xbf16>, vector<33x128xf32> -> vector<33x128xf32>
    %c0_36 = arith.constant 0 : index
    %c0_37 = arith.constant 0 : index
    %87 = vector.load %arg11[%c0_36, %c0_37] : memref<33x1xf32, #tpu.memory_space<vmem>>, vector<33x1xf32>
    %88 = vector.broadcast %87 : vector<33x1xf32> to vector<33x128xf32>
    %89 = arith.addf %86, %88 : vector<33x128xf32>
    %90 = tpu.iota {dimensions = array<i32: 0>} : vector<33x1xi32>
    %c32_i32 = arith.constant 32 : i32
    %91 = vector.broadcast %c32_i32 : i32 to vector<33x1xi32>
    %92 = arith.cmpi slt, %90, %91 : vector<33x1xi32>
    %93 = vector.shape_cast %92 : vector<33x1xi1> to vector<33x1xi1>
    %94 = vector.broadcast %93 : vector<33x1xi1> to vector<33x128xi1>
    %95 = vector.shape_cast %63 : vector<1x128xf32> to vector<1x128xf32>
    %96 = vector.broadcast %95 : vector<1x128xf32> to vector<33x128xf32>
    %97 = vector.shape_cast %67 : vector<1x128xf32> to vector<1x128xf32>
    %98 = vector.broadcast %97 : vector<1x128xf32> to vector<33x128xf32>
    %99 = arith.select %94, %96, %98 : vector<33x128xi1>, vector<33x128xf32>
    %100 = arith.mulf %89, %99 : vector<33x128xf32>
    %101 = tpu.iota {dimensions = array<i32: 1>} : vector<1x32xi32>
    %c0_38 = arith.constant 0 : index
    %c0_39 = arith.constant 0 : index
    %102 = vector.load %arg2[%c0_38, %c0_39] : memref<128x1xi32, #tpu.memory_space<vmem>>, vector<128x1xi32>
    %103 = vector.broadcast %101 : vector<1x32xi32> to vector<128x32xi32>
    %104 = vector.broadcast %102 : vector<128x1xi32> to vector<128x32xi32>
    %105 = arith.cmpi eq, %103, %104 : vector<128x32xi32>
    %106 = arith.extui %105 : vector<128x32xi1> to vector<128x32xi32>
    %107 = arith.sitofp %106 : vector<128x32xi32> to vector<128x32xf32>
    %108 = arith.truncf %107 : vector<128x32xf32> to vector<128x32xbf16>
    %c0_40 = arith.constant 0 : index
    %c0_41 = arith.constant 0 : index
    %109 = vector.load %arg16[%c0_40, %c0_41] : memref<33x32xf32, #tpu.memory_space<vmem>>, vector<33x32xf32>
    %110 = arith.truncf %100 : vector<33x128xf32> to vector<33x128xbf16>
    %cst_42 = arith.constant dense<0.000000e+00> : vector<33x32xf32>
    %111 = tpu.matmul %110, %108, %cst_42 {dimension_numbers = #tpu.dot_dimension_numbers<[1], [0], [0], [1], [0, 0, 1, 1], [], []>} : vector<33x128xbf16>, vector<128x32xbf16>, vector<33x32xf32> -> vector<33x32xf32>
    %112 = arith.addf %109, %111 : vector<33x32xf32>
    %c0_43 = arith.constant 0 : index
    %c0_44 = arith.constant 0 : index
    %113 = vector.load %arg16[%c0_43, %c0_44] : memref<33x32xf32, #tpu.memory_space<vmem>>, vector<33x32xf32>
    tpu.vector_store %arg16[%c0_43, %c0_44], %112 {strides = array<i32>} : memref<33x32xf32, #tpu.memory_space<vmem>>, vector<33x32xf32>,
    %c2_i32 = arith.constant 2 : i32
    %114 = arith.cmpi eq, %arg0, %c2_i32 : i32
    %115 = arith.extui %114 : i1 to i32
    %c0_i32_45 = arith.constant 0 : i32
    %116 = arith.cmpi ne, %115, %c0_i32_45 : i32
    scf.if %116 {
      %c0_46 = arith.constant 0 : index
      %c0_47 = arith.constant 0 : index
      %117 = vector.load %arg16[%c0_46, %c0_47] : memref<33x32xf32, #tpu.memory_space<vmem>>, vector<33x32xf32>
      %118 = vector.extract_strided_slice %117 {offsets = [0, 0], sizes = [32, 32], strides = [1, 1]} : vector<33x32xf32> to vector<32x32xf32>
      %119 = vector.extract_strided_slice %117 {offsets = [32, 0], sizes = [1, 32], strides = [1, 1]} : vector<33x32xf32> to vector<1x32xf32>
      %cst_48 = arith.constant 1.000000e+00 : f32
      %120 = vector.broadcast %cst_48 : f32 to vector<1x32xf32>
      %121 = arith.maximumf %119, %120 : vector<1x32xf32>
      %cst_49 = arith.constant 1.000000e+00 : f32
      %122 = vector.broadcast %cst_49 : f32 to vector<1x32xf32>
      %123 = arith.divf %122, %121 : vector<1x32xf32>
      %124 = vector.broadcast %123 : vector<1x32xf32> to vector<32x32xf32>
      %125 = arith.mulf %118, %124 : vector<32x32xf32>
      %cst_50 = arith.constant 0.000000e+00 : f32
      %126 = vector.broadcast %cst_50 : f32 to vector<1x32xf32>
      %127 = arith.cmpf ogt, %119, %126 : vector<1x32xf32>
      %128 = arith.extui %127 : vector<1x32xi1> to vector<1x32xi32>
      %129 = arith.sitofp %128 : vector<1x32xi32> to vector<1x32xf32>
      %130 = vector.broadcast %129 : vector<1x32xf32> to vector<32x32xf32>
      %131 = arith.mulf %125, %130 : vector<32x32xf32>
      %132 = arith.mulf %131, %131 : vector<32x32xf32>
      %133 = vector.shape_cast %132 : vector<32x32xf32> to vector<1x32x32xf32>
      %cst_51 = arith.constant dense<0.000000e+00> : vector<1xf32>
      %134 = vector.multi_reduction <add>, %133, %cst_51 [1, 2] : vector<1x32x32xf32> to vector<1xf32>
      %135 = vector.shape_cast %134 : vector<1xf32> to vector<1x1x1xf32>
      %136 = vector.extract %135[0, 0, 0] : f32 from vector<1x1x1xf32>
      %137 = vector.broadcast %136 : f32 to vector<1x1xf32>
      %138 = vector.shape_cast %119 : vector<1x32xf32> to vector<1x1x32xf32>
      %cst_52 = arith.constant dense<0.000000e+00> : vector<1xf32>
      %139 = vector.multi_reduction <add>, %138, %cst_52 [1, 2] : vector<1x1x32xf32> to vector<1xf32>
      %140 = vector.shape_cast %139 : vector<1xf32> to vector<1x1x1xf32>
      %141 = vector.extract %140[0, 0, 0] : f32 from vector<1x1x1xf32>
      %142 = vector.broadcast %141 : f32 to vector<1x1xf32>
      %143 = tpu.iota {dimensions = array<i32: 1>} : vector<1x4xi32>
      %c0_53 = arith.constant 0 : index
      %c0_54 = arith.constant 0 : index
      %144 = vector.load %arg5[%c0_53, %c0_54] : memref<32x1xi32, #tpu.memory_space<vmem>>, vector<32x1xi32>
      %145 = vector.broadcast %143 : vector<1x4xi32> to vector<32x4xi32>
      %146 = vector.broadcast %144 : vector<32x1xi32> to vector<32x4xi32>
      %147 = arith.cmpi eq, %145, %146 : vector<32x4xi32>
      %148 = arith.extui %147 : vector<32x4xi1> to vector<32x4xi32>
      %149 = arith.sitofp %148 : vector<32x4xi32> to vector<32x4xf32>
      %cst_55 = arith.constant dense<0.000000e+00> : vector<32x4xf32>
      %150 = tpu.matmul %131, %149, %cst_55 {dimension_numbers = #tpu.dot_dimension_numbers<[1], [0], [0], [1], [0, 0, 1, 1], [], []>} : vector<32x32xf32>, vector<32x4xf32>, vector<32x4xf32> -> vector<32x4xf32>
      %cst_56 = arith.constant dense<0.000000e+00> : vector<4xf32>
      %151 = vector.multi_reduction <add>, %149, %cst_56 [0] : vector<32x4xf32> to vector<4xf32>
      %152 = vector.shape_cast %151 : vector<4xf32> to vector<1x4xf32>
      %cst_57 = arith.constant 1.000000e+00 : f32
      %153 = vector.broadcast %cst_57 : f32 to vector<1x4xf32>
      %154 = arith.maximumf %152, %153 : vector<1x4xf32>
      %cst_58 = arith.constant 1.000000e+00 : f32
      %155 = vector.broadcast %cst_58 : f32 to vector<1x4xf32>
      %156 = arith.divf %155, %154 : vector<1x4xf32>
      %157 = vector.broadcast %156 : vector<1x4xf32> to vector<32x4xf32>
      %158 = arith.mulf %150, %157 : vector<32x4xf32>
      %cst_59 = arith.constant 0.000000e+00 : f32
      %159 = vector.broadcast %cst_59 : f32 to vector<1x4xf32>
      %160 = arith.cmpf ogt, %152, %159 : vector<1x4xf32>
      %161 = arith.extui %160 : vector<1x4xi1> to vector<1x4xi32>
      %162 = arith.sitofp %161 : vector<1x4xi32> to vector<1x4xf32>
      %163 = vector.broadcast %162 : vector<1x4xf32> to vector<32x4xf32>
      %164 = arith.mulf %158, %163 : vector<32x4xf32>
      %c0_60 = arith.constant 0 : index
      %c0_61 = arith.constant 0 : index
      %165 = vector.load %arg12[%c0_60, %c0_61] : memref<2x32xf32, #tpu.memory_space<vmem>>, vector<2x32xf32>
      %cst_62 = arith.constant dense<0.000000e+00> : vector<2x4xf32>
      %166 = tpu.matmul %165, %164, %cst_62 {dimension_numbers = #tpu.dot_dimension_numbers<[1], [0], [0], [1], [0, 0, 1, 1], [], []>} : vector<2x32xf32>, vector<32x4xf32>, vector<2x4xf32> -> vector<2x4xf32>
      %c0_63 = arith.constant 0 : index
      %c0_64 = arith.constant 0 : index
      %167 = vector.load %arg13[%c0_63, %c0_64] : memref<2x1xf32, #tpu.memory_space<vmem>>, vector<2x1xf32>
      %168 = vector.broadcast %167 : vector<2x1xf32> to vector<2x4xf32>
      %169 = arith.addf %166, %168 : vector<2x4xf32>
      %c0_65 = arith.constant 0 : index
      %c0_66 = arith.constant 0 : index
      %170 = vector.load %arg14[%c0_65, %c0_66] : memref<2x4xf32, #tpu.memory_space<vmem>>, vector<2x4xf32>
      tpu.vector_store %arg14[%c0_65, %c0_66], %169 {strides = array<i32>} : memref<2x4xf32, #tpu.memory_space<vmem>>, vector<2x4xf32>,
      %171 = tpu.iota {dimensions = array<i32: 1>} : vector<1x128xi32>
      %c0_67 = arith.constant 0 : index
      %c0_68 = arith.constant 0 : index
      %172 = vector.load %arg17[%c0_67, %c0_68] : memref<1x1xf32, #tpu.memory_space<vmem>>, vector<1x1xf32>
      %cst_69 = arith.constant 0.00333333341 : f32
      %173 = vector.broadcast %cst_69 : f32 to vector<1x1xf32>
      %174 = arith.mulf %172, %173 : vector<1x1xf32>
      %c0_i32_70 = arith.constant 0 : i32
      %175 = vector.broadcast %c0_i32_70 : i32 to vector<1x128xi32>
      %176 = arith.cmpi eq, %171, %175 : vector<1x128xi32>
      %cst_71 = arith.constant 0.000000e+00 : f32
      %177 = vector.shape_cast %174 : vector<1x1xf32> to vector<1x1xf32>
      %178 = vector.broadcast %177 : vector<1x1xf32> to vector<1x128xf32>
      %179 = vector.broadcast %cst_71 : f32 to vector<1x128xf32>
      %180 = arith.select %176, %178, %179 : vector<1x128xi1>, vector<1x128xf32>
      %c1_i32 = arith.constant 1 : i32
      %181 = vector.broadcast %c1_i32 : i32 to vector<1x128xi32>
      %182 = arith.cmpi eq, %171, %181 : vector<1x128xi32>
      %cst_72 = arith.constant 0.000000e+00 : f32
      %183 = vector.shape_cast %137 : vector<1x1xf32> to vector<1x1xf32>
      %184 = vector.broadcast %183 : vector<1x1xf32> to vector<1x128xf32>
      %185 = vector.broadcast %cst_72 : f32 to vector<1x128xf32>
      %186 = arith.select %182, %184, %185 : vector<1x128xi1>, vector<1x128xf32>
      %187 = arith.addf %180, %186 : vector<1x128xf32>
      %c2_i32_73 = arith.constant 2 : i32
      %188 = vector.broadcast %c2_i32_73 : i32 to vector<1x128xi32>
      %189 = arith.cmpi eq, %171, %188 : vector<1x128xi32>
      %cst_74 = arith.constant 0.000000e+00 : f32
      %190 = vector.shape_cast %142 : vector<1x1xf32> to vector<1x1xf32>
      %191 = vector.broadcast %190 : vector<1x1xf32> to vector<1x128xf32>
      %192 = vector.broadcast %cst_74 : f32 to vector<1x128xf32>
      %193 = arith.select %189, %191, %192 : vector<1x128xi1>, vector<1x128xf32>
      %194 = arith.addf %187, %193 : vector<1x128xf32>
      %c0_75 = arith.constant 0 : index
      %c0_76 = arith.constant 0 : index
      %195 = vector.load %arg15[%c0_75, %c0_76] : memref<1x128xf32, #tpu.memory_space<vmem>>, vector<1x128xf32>
      tpu.vector_store %arg15[%c0_75, %c0_76], %194 {strides = array<i32>} : memref<1x128xf32, #tpu.memory_space<vmem>>, vector<1x128xf32>,
    } else {
    }
    return
  }
  func.func @transform_0(%arg0: i32) -> (i32, i32) {
    %c0_i32 = arith.constant 0 : i32
    %c0_i32_0 = arith.constant 0 : i32
    return %c0_i32, %arg0 : i32, i32
  }
  func.func @transform_1(%arg0: i32) -> (i32, i32) {
    %c0_i32 = arith.constant 0 : i32
    %c0_i32_0 = arith.constant 0 : i32
    return %arg0, %c0_i32 : i32, i32
  }
  func.func @transform_2(%arg0: i32) -> (i32, i32) {
    %c0_i32 = arith.constant 0 : i32
    %c0_i32_0 = arith.constant 0 : i32
    return %c0_i32, %arg0 : i32, i32
  }
  func.func @transform_3(%arg0: i32) -> (i32, i32) {
    %c0_i32 = arith.constant 0 : i32
    %c0_i32_0 = arith.constant 0 : i32
    return %c0_i32, %arg0 : i32, i32
  }
  func.func @transform_4(%arg0: i32) -> (i32, i32) {
    %c0_i32 = arith.constant 0 : i32
    %c0_i32_0 = arith.constant 0 : i32
    %c0_i32_1 = arith.constant 0 : i32
    return %c0_i32, %c0_i32_0 : i32, i32
  }
  func.func @transform_5(%arg0: i32) -> (i32, i32) {
    %c0_i32 = arith.constant 0 : i32
    %c0_i32_0 = arith.constant 0 : i32
    %c0_i32_1 = arith.constant 0 : i32
    return %c0_i32, %c0_i32_0 : i32, i32
  }
  func.func @transform_6(%arg0: i32) -> (i32, i32) {
    %c0_i32 = arith.constant 0 : i32
    %c0_i32_0 = arith.constant 0 : i32
    %c0_i32_1 = arith.constant 0 : i32
    return %c0_i32, %c0_i32_0 : i32, i32
  }
  func.func @transform_7(%arg0: i32) -> (i32, i32) {
    %c0_i32 = arith.constant 0 : i32
    %c0_i32_0 = arith.constant 0 : i32
    %c0_i32_1 = arith.constant 0 : i32
    return %c0_i32, %c0_i32_0 : i32, i32
  }
  func.func @transform_8(%arg0: i32) -> (i32, i32) {
    %c0_i32 = arith.constant 0 : i32
    %c0_i32_0 = arith.constant 0 : i32
    %c0_i32_1 = arith.constant 0 : i32
    return %c0_i32, %c0_i32_0 : i32, i32
  }
  func.func @transform_9(%arg0: i32) -> (i32, i32) {
    %c0_i32 = arith.constant 0 : i32
    %c0_i32_0 = arith.constant 0 : i32
    %c0_i32_1 = arith.constant 0 : i32
    return %c0_i32, %c0_i32_0 : i32, i32
  }
  func.func @transform_10(%arg0: i32) -> (i32, i32) {
    %c0_i32 = arith.constant 0 : i32
    %c0_i32_0 = arith.constant 0 : i32
    %c0_i32_1 = arith.constant 0 : i32
    return %c0_i32, %c0_i32_0 : i32, i32
  }
  func.func @transform_11(%arg0: i32) -> (i32, i32) {
    %c0_i32 = arith.constant 0 : i32
    %c0_i32_0 = arith.constant 0 : i32
    %c0_i32_1 = arith.constant 0 : i32
    return %c0_i32, %c0_i32_0 : i32, i32
  }
  func.func @transform_12(%arg0: i32) -> (i32, i32) {
    %c0_i32 = arith.constant 0 : i32
    %c0_i32_0 = arith.constant 0 : i32
    %c0_i32_1 = arith.constant 0 : i32
    return %c0_i32, %c0_i32_0 : i32, i32
  }
  func.func @transform_13(%arg0: i32) -> (i32, i32) {
    %c0_i32 = arith.constant 0 : i32
    %c0_i32_0 = arith.constant 0 : i32
    %c0_i32_1 = arith.constant 0 : i32
    return %c0_i32, %c0_i32_0 : i32, i32
  }
  func.func @transform_14(%arg0: i32) -> (i32, i32) {
    %c0_i32 = arith.constant 0 : i32
    %c0_i32_0 = arith.constant 0 : i32
    %c0_i32_1 = arith.constant 0 : i32
    return %c0_i32, %c0_i32_0 : i32, i32
  }
}

</mosaic_0001>

<bundles_post_ra>
// kernel: tpu_custom_call.1
= control target key start
LH: loop header
LB: loop body
LE: loop exit
PB: predicated region body
PF: predicated region fallthrough
CT: control target
= control target key end

     0   :  { %s2434_s0 = inlined_call_operand.vmem [shape: bf16[128,384], index: 0, kind: input, shape index: {}]   ;;  %s2435_s1 = inlined_call_operand.vmem [shape: s32[384,1], index: 1, kind: input, shape index: {}]   ;;  %s2436_s2 = inlined_call_operand.vmem [shape: bf16[32,384], index: 2, kind: input, shape index: {}]   ;;  %s2437_s3 = inlined_call_operand.vmem [shape: f32[1,384], index: 3, kind: input, shape index: {}]   ;;  %s2438_s4 = inlined_call_operand.vmem [shape: s32[32,1], index: 4, kind: input, shape index: {}]   ;;  %s2439_s5 = inlined_call_operand.vmem [shape: bf16[64,64], index: 5, kind: input, shape index: {}]   ;;  %s2440_s6 = inlined_call_operand.vmem [shape: f32[64,1], index: 6, kind: input, shape index: {}]   ;;  %s2441_s7 = inlined_call_operand.vmem [shape: f32[32,1], index: 7, kind: input, shape index: {}]   ;;  %s2442_s8 = inlined_call_operand.<no memory space> [shape: f32[1,1], index: 8, kind: input, shape index: {}]   ;;  %s2443_s9 = inlined_call_operand.vmem [shape: bf16[33,32], index: 9, kind: input, shape index: {}]   ;;  %s2444_s10 = inlined_call_operand.vmem [shape: f32[33,1], index: 10, kind: input, shape index: {}]   ;;  %s2445_s11 = inlined_call_operand.vmem [shape: f32[2,32], index: 11, kind: input, shape index: {}]   ;;  %s2446_s12 = inlined_call_operand.vmem [shape: f32[2,1], index: 12, kind: input, shape index: {}]   ;;  %s2447_s13 = inlined_call_operand.hbm [shape: f32[2,4], index: 13, kind: output, shape index: {0}]   ;;  %s2448_s14 = inlined_call_operand.hbm [shape: f32[1,128], index: 14, kind: output, shape index: {1}]  }
   0x1   :  { %v20_v0 = vstv %s2442_s8 }
   0x2   :  { %21 = vst [vmem:[#allocation4] sm:$0x1] %v20_v0 }
   0x3   :  { %22 = vsyncpa [#allocation8], 0 }
   0x4   :  { %23 = vsyncpa [#allocation10], 0  ;;  %s2064_s15 = smov 0   ;;  %s2066_s16 = smov 0  }
   0x5   :  { %s2068_s17 = smov 0  }
   0x6 LB: > { %s2080_s8 = sadd.s32 4294967295, %s1973_s17   ;;  %s2083_s18 = sadd.s32 1, %s1973_s17   ;;  %s1973_s17 = sphi %s2068_s17, %s2452_s17   ;;  %s1969_s16 = sphi %s2066_s16, %s2451_s16   ;;  %s1965_s15 = sphi %s2064_s15, %s2450_s15  }
   0x7   : > { %s33_s19 = ssub.s32 %s1973_s17, %s2083_s18  ;;  %s36_s20 = sadd.s32 1, %s1969_s16 }
   0x8   : > { %p34_p0 = scmp.eq.s32.totalorder %s33_s19, 0  ;;  %p43_p1 = scmp.ne.s32.totalorder %s1969_s16, %s1965_s15 }
   0x9   : > { %p44_p2 = scmp.eq.s32.totalorder %s1973_s17, 0  ;;  %p1633_p4 = scmp.ge.s32.totalorder %s1973_s17, 3 }
   0xa   : > { %s2092_s21 = scalar_select %p34_p0, %s1969_s16, %s36_s20  }
   0xb   : > { %p2094_p3 = por %p44_p2, %p43_p1  ;;  %405 = sbr.rel (%p1633_p4) target bundleno = 44 (0x2c), region = 52 }
  0x10   : > { %408 = sbr.rel (!%p2094_p3) target bundleno = 36 (0x24), region = 56  ;;  %s410_s23 = sand.u32 (%p2094_p3), 1, %s1969_s16  }
  0x11   : > { %s1635_s24 = sshll.u32 (%p2094_p3), %s1973_s17, 2  ;;  %s1634_s25 = sshll.u32 (%p2094_p3), %s410_s23, 6 }
  0x12   : > { %s2106_s28 = scalar_lea.vmem (%p2094_p3), %s2434_s0, %s1635_s24  ;;  %s412_s29 = scalar_lea.vmem (%p2094_p3), [#allocation5], %s1634_s25 }
  0x13   : > { %v431_v1 = vld [vmem:[%s2106_s28] sm:$0xf] (%p2094_p3)  ;;  %v433_v2 = vld [vmem:[%s2106_s28 + $0xc] sm:$0xf] (%p2094_p3)  ;;  %v435_v3 = vld [vmem:[%s2106_s28 + $0x18] sm:$0xf] (%p2094_p3) }
  0x14   : > { %432 = vst [vmem:[%s412_s29] sm:$0xf] (%p2094_p3), %v431_v1  ;;  %v437_v4 = vld [vmem:[%s2106_s28 + $0x24] sm:$0xf] (%p2094_p3)  ;;  %v439_v5 = vld [vmem:[%s2106_s28 + $0x30] sm:$0xf] (%p2094_p3) }
  0x15   : > { %434 = vst [vmem:[%s412_s29 + $0x4] sm:$0xf] %v433_v2  ;;  %v441_v6 = vld [vmem:[%s2106_s28 + $0x3c] sm:$0xf]  ;;  %v443_v7 = vld [vmem:[%s2106_s28 + $0x48] sm:$0xf] }
  0x16   : > { %436 = vst [vmem:[%s412_s29 + $0x8] sm:$0xf] %v435_v3  ;;  %v445_v8 = vld [vmem:[%s2106_s28 + $0x54] sm:$0xf]  ;;  %v447_v9 = vld [vmem:[%s2106_s28 + $0x60] sm:$0xf] }
  0x17   : > { %438 = vst [vmem:[%s412_s29 + $0xc] sm:$0xf] %v437_v4  ;;  %v449_v10 = vld [vmem:[%s2106_s28 + $0x6c] sm:$0xf]  ;;  %v451_v11 = vld [vmem:[%s2106_s28 + $0x78] sm:$0xf] }
  0x18   : > { %440 = vst [vmem:[%s412_s29 + $0x10] sm:$0xf] %v439_v5  ;;  %v453_v12 = vld [vmem:[%s2106_s28 + $0x84] sm:$0xf]  ;;  %v455_v13 = vld [vmem:[%s2106_s28 + $0x90] sm:$0xf] }
  0x19   : > { %442 = vst [vmem:[%s412_s29 + $0x14] sm:$0xf] %v441_v6  ;;  %v457_v14 = vld [vmem:[%s2106_s28 + $0x9c] sm:$0xf]  ;;  %v459_v15 = vld [vmem:[%s2106_s28 + $0xa8] sm:$0xf] }
  0x1a   : > { %444 = vst [vmem:[%s412_s29 + $0x18] sm:$0xf] %v443_v7  ;;  %v461_v16 = vld [vmem:[%s2106_s28 + $0xb4] sm:$0xf] }
  0x1b   : > { %446 = vst [vmem:[%s412_s29 + $0x1c] sm:$0xf] %v445_v8 }
  0x1c   : > { %448 = vst [vmem:[%s412_s29 + $0x20] sm:$0xf] %v447_v9 }
  0x1d   : > { %450 = vst [vmem:[%s412_s29 + $0x24] sm:$0xf] %v449_v10 }
  0x1e   : > { %452 = vst [vmem:[%s412_s29 + $0x28] sm:$0xf] %v451_v11 }
  0x1f   : > { %454 = vst [vmem:[%s412_s29 + $0x2c] sm:$0xf] %v453_v12 }
  0x20   : > { %456 = vst [vmem:[%s412_s29 + $0x30] sm:$0xf] %v455_v13 }
  0x21   : > { %458 = vst [vmem:[%s412_s29 + $0x34] sm:$0xf] %v457_v14 }
  0x22   : > { %460 = vst [vmem:[%s412_s29 + $0x38] sm:$0xf] %v459_v15 }
  0x23   : > { %462 = vst [vmem:[%s412_s29 + $0x3c] sm:$0xf] %v461_v16 }
  0x24 PF: > { %527 = sbr.rel (!%p2094_p3) target bundleno = 44 (0x2c), region = 101  ;;  %s529_s30 = sand.u32 (%p2094_p3), 1, %s1969_s16  }
  0x25   : > { %s1637_s19 = sshll.u32 (%p2094_p3), %s1973_s17, 2  ;;  %s1636_s20 = sshll.u32 (%p2094_p3), %s529_s30, 4 }
  0x26   : > { %s533_s25 = scalar_lea.vmem (%p2094_p3), %s2436_s2, %s1637_s19  ;;  %s531_s26 = scalar_lea.vmem (%p2094_p3), [#allocation6], %s1636_s20 }
  0x27   : > { %v550_v17 = vld [vmem:[%s533_s25] sm:$0xf] (%p2094_p3)  ;;  %v552_v18 = vld [vmem:[%s533_s25 + $0xc] sm:$0xf] (%p2094_p3)  ;;  %v554_v19 = vld [vmem:[%s533_s25 + $0x18] sm:$0xf] (%p2094_p3) }
  0x28   : > { %551 = vst [vmem:[%s531_s26] sm:$0xf] (%p2094_p3), %v550_v17  ;;  %v556_v20 = vld [vmem:[%s533_s25 + $0x24] sm:$0xf] (%p2094_p3) }
  0x29   : > { %553 = vst [vmem:[%s531_s26 + $0x4] sm:$0xf] %v552_v18 }
  0x2a   : > { %555 = vst [vmem:[%s531_s26 + $0x8] sm:$0xf] %v554_v19 }
  0x2b   : > { %557 = vst [vmem:[%s531_s26 + $0xc] sm:$0xf] %v556_v20 }
  0x2c PF: > { %p1638_p5 = scmp.ge.s32.totalorder %s1973_s17, 1  ;;  %p594_p6 = scmp.lt.s32.totalorder %s1973_s17, 4 }
  0x2e   : > { %p595_p7 = pnand %p1638_p5, %p594_p6 }
  0x2f   : > { %s601_s22 = sand.u32 (!%p595_p7), 1, %s1965_s15   ;;  %s1641_s27 = sshll.u32 (!%p595_p7), %s2080_s8, 4 }
  0x30   : > { %598 = sbr.rel (%p595_p7) target bundleno = 1008 (0x3f0), region = 146  ;;  %s1639_s28 = sshll.u32 (!%p595_p7), %s601_s22, 6 }
  0x31   : > { %s2135_s29 = sshll.u32 (!%p595_p7), %s601_s22, 4  ;;  %p661_p8 = scmp.lt.s32.totalorder (!%p595_p7), %s1641_s27, 47 }
  0x32   : > { %p666_p9 = scmp.lt.s32.totalorder (!%p595_p7), %s2080_s8, 2  ;;  %s2150_s26 = scalar_lea.vmem (!%p595_p7), [#allocation5], %s1639_s28 }
  0x33   : > { %s610_s22 = scalar_lea.vmem (!%p595_p7), [#allocation6], %s2135_s29  ;;  %p1643_p10 = scmp.ne.s32.totalorder (!%p595_p7), %s2080_s8, 0 }
  0x35   : > { %s2454_s27 = smov (!%p661_p8, %s1641_s27), 47  ;;  %673 = sbr.rel (%p1643_p10) target bundleno = 65 (0x41), region = 158 }
  0x36   : > { %s2139_s30 = scalar_select %p666_p9, %s2080_s8, 2 }
  0x37   : > { %s1642_s19 = sshll.u32 %s2454_s27, 3 }
  0x38   : > { %s2144_s23 = scalar_lea.vmem %s2435_s1, %s1642_s19  ;;  %s668_s15 = scalar_lea.vmem %s2437_s3, %s2139_s30 }
  0x3a   : > { %vm674_vm0 = vcmask 261120   ;;  %v1975_v21 = vmov 0.0   ;;  %vm679_vm1 = vcmask 253952   ;;  %vm681_vm2 = vcmask 0  }
  0x3b   : > { %675 = vst.msk [vmem:[#allocation2] sm:$0xff] %vm674_vm0, %v1975_v21 }
  0x3c   : > { %676 = vst.msk [vmem:[#allocation2 + $0x8] sm:$0xff] %vm674_vm0, %v1975_v21 }
  0x3d   : > { %677 = vst.msk [vmem:[#allocation2 + $0x10] sm:$0xff] %vm674_vm0, %v1975_v21 }
  0x3e   : > { %678 = vst.msk [vmem:[#allocation2 + $0x18] sm:$0xff] %vm674_vm0, %v1975_v21 }
  0x3f   : > { %680 = vst.msk [vmem:[#allocation2 + $0x20] sm:$0x1] %vm679_vm1, %v1975_v21 }
  0x40   : > { %682 = vst.msk [vmem:[#allocation3] sm:$0x1] %vm681_vm2, %v1975_v21 }
  0x41 PF: > { %v749_v22 = vld [vmem:[%s2440_s6 + $0x30] sm:$0xff]  ;;  %v747_v23 = vld [vmem:[%s2440_s6 + $0x20] sm:$0xff]  ;;  %v1976_v25 = vmov 0   ;;  %v750_v51 = vld [vmem:[%s2440_s6 + $0x38] sm:$0xff]  ;;  %vm811_vm3 = vcmask 523264   ;;  %s1644_s30 = sshll.u32 %s2080_s8, 7 }
  0x42   : > { %v1783_v24 = vld [vmem:[%s2150_s26 + $0x18] sm:$0xff]   ;;  %1863 = vset.pattern.permute.xlu1 %v1976_v25  ;;  %1862 = vset.pattern.permute.xlu0 %v1976_v25  ;;  %v1782_v31 = vld [vmem:[%s2150_s26 + $0x10] sm:$0xff]   ;;  %v1781_v33 = vld [vmem:[%s2150_s26 + $0x8] sm:$0xff]   ;;  %p1713_p11 = scmp.ne.s32.totalorder %s2080_s8, 2 }
  0x43   : > { %v1755_v26 = vunpack.c.l.bf16 %v1783_v24  ;;  %v1756_v27 = vunpack.c.h.bf16 %v1783_v24  ;;  %v1787_v28 = vld [vmem:[%s2150_s26 + $0x38] sm:$0xff]   ;;  %783 = vperm.xlu0 %1862, %v749_v22   ;;  %773 = vperm.xlu1 %1863, %v747_v23   ;;  %v1786_v32 = vld [vmem:[%s2150_s26 + $0x30] sm:$0xff]   ;;  %v1751_v34 = vunpack.c.l.bf16 %v1782_v31  ;;  %v1752_v35 = vunpack.c.h.bf16 %v1782_v31  ;;  %v1785_v38 = vld [vmem:[%s2150_s26 + $0x28] sm:$0xff]  }
  0x44   : > { %v1771_v29 = vunpack.c.l.bf16 %v1787_v28  ;;  %v1772_v30 = vunpack.c.h.bf16 %v1787_v28  ;;  %v1767_v36 = vunpack.c.l.bf16 %v1786_v32  ;;  %v1768_v37 = vunpack.c.h.bf16 %v1786_v32  ;;  %1864 = vset.pattern.permute.xlu2 %v1976_v25  ;;  %v1742_v43 = vld [vmem:[%s2150_s26] sm:$0xff]   ;;  %v743_v50 = vld [vmem:[%s2440_s6] sm:$0xff]  ;;  %v746_v0 = vld [vmem:[%s2440_s6 + $0x18] sm:$0xff] }
  0x45   : > { %v1747_v41 = vunpack.c.l.bf16 %v1781_v33  ;;  %v1748_v42 = vunpack.c.h.bf16 %v1781_v33  ;;  %v1784_v44 = vld [vmem:[%s2150_s26 + $0x20] sm:$0xff]   ;;  %v1763_v47 = vunpack.c.l.bf16 %v1785_v38  ;;  %v1764_v48 = vunpack.c.h.bf16 %v1785_v38  ;;  %753 = vperm.xlu2 %1864, %v743_v50   ;;  %v1735_v3 = vld [vmem:[%s2439_s5] sm:$0xff]  ;;  %v876_v8 = vld [vmem:[%s2441_s7 + $0x18] sm:$0xff] }
  0x46   : > { %v729_v39 = vmul.f32 %v1771_v29, %v1755_v26  ;;  %v730_v40 = vmul.f32 %v1772_v30, %v1756_v27  ;;  %v727_v45 = vmul.f32 %v1767_v36, %v1751_v34  ;;  %v728_v46 = vmul.f32 %v1768_v37, %v1752_v35  ;;  %v748_v52 = vld [vmem:[%s2440_s6 + $0x28] sm:$0xff]  ;;  %v745_v1 = vld [vmem:[%s2440_s6 + $0x10] sm:$0xff]  ;;  %v873_v5 = vld [vmem:[%s2441_s7] sm:$0xff] }
  0x47   : > { %v1743_v53 = vunpack.c.l.bf16 %v1742_v43  ;;  %v1744_v54 = vunpack.c.h.bf16 %v1742_v43  ;;  %v1759_v55 = vunpack.c.l.bf16 %v1784_v44  ;;  %v725_v57 = vmul.f32 %v1763_v47, %v1747_v41  ;;  %v744_v63 = vld [vmem:[%s2440_s6 + $0x8] sm:$0xff]  ;;  %v875_v6 = vld [vmem:[%s2441_s7 + $0x10] sm:$0xff]  ;;  %v1138_v12 = vld [vmem:[%s2144_s23 + $0x78] sm:$0xff] }
  0x48   : > { %v734_v49 = vpack.c.bf16 %v730_v40, %v729_v39  ;;  %v733_v56 = vpack.c.bf16 %v728_v46, %v727_v45  ;;  %v726_v58 = vmul.f32 %v1764_v48, %v1748_v42  ;;  %v1760_v59 = vunpack.c.h.bf16 %v1784_v44  ;;  %v1736_v4 = vld [vmem:[%s2439_s5 + $0x8] sm:$0xff]  ;;  %v1137_v9 = vld [vmem:[%s2144_s23 + $0x70] sm:$0xff]  ;;  %v1135_v14 = vld [vmem:[%s2144_s23 + $0x60] sm:$0xff] }
  0x49   : > { %v723_v61 = vmul.f32 %v1759_v55, %v1743_v53  ;;  %v874_v7 = vld [vmem:[%s2441_s7 + $0x8] sm:$0xff]  ;;  %v1737_v11 = vld [vmem:[%s2439_s5 + $0x10] sm:$0xff]  ;;  %v1131_v16 = vld [vmem:[%s2144_s23 + $0x40] sm:$0xff]  ;;  %v683_v42 = vlaneseq }
  0x4a   : > { %828 = vmatpush.bf16.msra.mxu0 %v734_v49  ;;  %1789 = vmatpush.bf16.msra.mxu3 %v734_v49  ;;  %v732_v60 = vpack.c.bf16 %v726_v58, %v725_v57  ;;  %v724_v62 = vmul.f32 %v1760_v59, %v1744_v54  ;;  %v910_v10 = vld [vmem:[#allocation4] sm:$0x1]  ;;  %v1133_v15 = vld [vmem:[%s2144_s23 + $0x50] sm:$0xff]  ;;  %v1134_v17 = vld [vmem:[%s2144_s23 + $0x58] sm:$0xff]  ;;  %v1977_v54 = vmov 1.0|1.0  }
  0x4b   : > { %788 = vperm.xlu0 %1862, %v750_v51   ;;  %778 = vperm.xlu1 %1863, %v748_v52   ;;  %v1136_v13 = vld [vmem:[%s2144_s23 + $0x68] sm:$0xff]  ;;  %v1738_v18 = vld [vmem:[%s2439_s5 + $0x18] sm:$0xff]  ;;  %v1129_v21 = vld [vmem:[%s2144_s23 + $0x30] sm:$0xff]  ;;  %v2255_v47 = vand.u32 127, %v683_v42  ;;  %v1978_v59 = vmov 0.6931472  }
  0x4c   : > { %v731_v2 = vpack.c.bf16 %v724_v62, %v723_v61  ;;  %v1132_v19 = vld [vmem:[%s2144_s23 + $0x48] sm:$0xff]  ;;  %v1130_v20 = vld [vmem:[%s2144_s23 + $0x38] sm:$0xff]  ;;  %v1127_v22 = vld [vmem:[%s2144_s23 + $0x20] sm:$0xff]  ;;  %1865 = vrcp.f32 %v1978_v59 }
  0x4d   : > { %758 = vperm.xlu2 %1864, %v744_v63   ;;  %v1125_v23 = vld [vmem:[%s2144_s23 + $0x10] sm:$0xff]  ;;  %v1128_v24 = vld [vmem:[%s2144_s23 + $0x28] sm:$0xff]  ;;  %v1126_v25 = vld [vmem:[%s2144_s23 + $0x18] sm:$0xff] }
  0x4e   : > { %829 = vmatpush.bf16.msra.mxu0 %v733_v56  ;;  %1790 = vmatpush.bf16.msra.mxu3 %v733_v56  ;;  %v1017_v26 = vld [vmem:[%s2444_s10 + $0x18] sm:$0xff]  ;;  %v1016_v27 = vld [vmem:[%s2444_s10 + $0x10] sm:$0xff]  ;;  %v1123_v28 = vld [vmem:[%s2144_s23] sm:$0xff] }
  0x4f   : > { %v1018_v29 = vld [vmem:[%s2444_s10 + $0x20] sm:$0x1]  ;;  %v1124_v30 = vld [vmem:[%s2144_s23 + $0x8] sm:$0xff] }
  0x50   : > { %v1015_v31 = vld [vmem:[%s2444_s10 + $0x8] sm:$0xff]  ;;  %v1014_v44 = vld [vmem:[%s2444_s10] sm:$0xff] }
  0x51   : > { %v1774_v53 = vld [vmem:[%s610_s22] sm:$0xff]  }
  0x52   : > { %830 = vmatpush.bf16.msra.mxu0 %v732_v60  ;;  %1791 = vmatpush.bf16.msra.mxu3 %v732_v60  ;;  %v1775_v56 = vunpack.c.l.bf16 %v1774_v53  ;;  %v1788_v60 = vld [vmem:[%s610_s22 + $0x8] sm:$0xff]  }
  0x53   : > { %768 = vperm.xlu1 %1863, %v746_v0   ;;  %763 = vperm.xlu0 %1862, %v745_v1   ;;  %v1776_v1 = vunpack.c.h.bf16 %v1774_v53 }
  0x55   : > { %879 = vperm.xlu2 %1864, %v873_v5  }
  0x56   : > { %831 = vmatpush.bf16.msra.mxu0 %v731_v2  ;;  %1792 = vmatpush.bf16.msra.mxu3 %v731_v2 }
  0x59   : > { %1662 = vmatmul.msk.bf16.vlgmr.msra.gmra.mxu0 %vm811_vm3, %v1735_v3  ;;  %1663 = vmatmul.msk.bf16.vlgmr.msra.gmra.mxu3 %vm811_vm3, %v1736_v4  ;;  %v1779_v4 = vunpack.c.l.bf16 %v1788_v60 }
  0x5b   : > { %889 = vperm.xlu1 %1863, %v875_v6   ;;  %884 = vperm.xlu0 %1862, %v874_v7   ;;  %v2271_v7 = vpop.eup %1865 }
  0x5d   : > { %894 = vperm.xlu2 %1864, %v876_v8  }
  0x63   : > { %1182 = vperm.xlu1 %1863, %v1137_v9   ;;  %913 = vperm.xlu0 %1862, %v910_v10  }
  0x65   : > { %1185 = vperm.xlu2 %1864, %v1138_v12  }
  0x69   : > { %1664 = vmatmul.msk.bf16.gmra.mxu3 %vm811_vm3, %v1737_v11  ;;  %v1780_v11 = vunpack.c.h.bf16 %v1788_v60 }
  0x6b   : > { %1179 = vperm.xlu1 %1863, %v1136_v13   ;;  %1176 = vperm.xlu0 %1862, %v1135_v14  }
  0x6d   : > { %1170 = vperm.xlu2 %1864, %v1133_v15   ;;  %v1979_v15 = vmov 0.66  }
  0x6e   : > { %1867 = vrcp.f32 %v1979_v15 }
  0x73   : > { %1164 = vperm.xlu1 %1863, %v1131_v16   ;;  %1173 = vperm.xlu0 %1862, %v1134_v17   ;;  %v922_v16 = vmul.f32 0.6931472, %v2271_v7 }
  0x75   : > { %1167 = vperm.xlu2 %1864, %v1132_v19  }
  0x79   : > { %1665 = vmatmul.msk.bf16.gmra.mxu3 %vm811_vm3, %v1738_v18  ;;  %vm926_vm3 = vweird.f32 %v2271_v7 }
  0x7b   : > { %1161 = vperm.xlu1 %1863, %v1130_v20   ;;  %1158 = vperm.xlu0 %1862, %v1129_v21   ;;  %v918_v20 = vld [vmem:[%s668_s15] sm:$0x1] }
  0x7c   : > { %1869 = vlog2.f32 %v918_v20 }
  0x7d   : > { %1152 = vperm.xlu2 %1864, %v1127_v22  }
  0x83   : > { %1146 = vperm.xlu1 %1863, %v1125_v23   ;;  %1155 = vperm.xlu0 %1862, %v1128_v24   ;;  %v923_v24 = vsub.f32 1.0, %v922_v16 }
  0x85   : > { %1149 = vperm.xlu2 %1864, %v1126_v25   ;;  %v930_v25 = vsub.f32 1.0, %v918_v20 }
  0x87   : > { %1871 = vlog2.f32 %v930_v25 }
  0x8b   : > { %1036 = vperm.xlu1 %1863, %v1017_v26   ;;  %1031 = vperm.xlu0 %1862, %v1016_v27   ;;  %v1868_v26 = vpop.eup %1867 }
  0x8c   : > { %v1870_v42 = vpop.eup %1869 }
  0x8d   : > { %1140 = vperm.xlu2 %1864, %v1123_v28  }
  0x93   : > { %1041 = vperm.xlu1 %1863, %v1018_v29   ;;  %1143 = vperm.xlu0 %1862, %v1124_v30  }
  0x95   : > { %1021 = vperm.xlu2 %1864, %v1014_v44  }
  0x9b   : > { %1026 = vperm.xlu0 %1862, %v1015_v31  }
  0x9f   : > { %v754_v32 = vpop.permute.xlu2 %753 }
  0xa7   : > { %v759_v33 = vpop.permute.xlu2 %758 }
  0xaf   : > { %v880_v36 = vpop.permute.xlu2 %879 }
  0xb5   : > { %v2242_v34 = vpop.permute.xlu0 %783  ;;  %v2244_v35 = vpop.permute.xlu1 %773 }
  0xb7   : > { %v2250_v39 = vpop.permute.xlu2 %894 }
  0xbd   : > { %v2246_v37 = vpop.permute.xlu0 %788  ;;  %v2248_v38 = vpop.permute.xlu1 %778 }
  0xbf   : > { %v1186_v43 = vpop.permute.xlu2 %1185 }
  0xc0   : > { %vm1202_vm4 = vcmp.eq.s32.totalorder %v2255_v47, %v1186_v43 }
  0xc5   : > { %v769_v40 = vpop.permute.xlu1 %768  ;;  %v764_v41 = vpop.permute.xlu0 %763 }
  0xc7   : > { %v1171_v52 = vpop.permute.xlu2 %1170 }
  0xc8   : > { %vm1197_vm10 = vcmp.eq.s32.totalorder %v2255_v47, %v1171_v52  ;;  %v920_v52 = vmul.f32 0.6931472, %v1870_v42 }
  0xcd   : > { %v890_v45 = vpop.permute.xlu1 %889  ;;  %v885_v46 = vpop.permute.xlu0 %884 }
  0xcf   : > { %v1168_v6 = vpop.permute.xlu2 %1167 }
  0xd0   : > { %vm1196_vm13 = vcmp.eq.s32.totalorder %v2255_v47, %v1168_v6 }
  0xd5   : > { %v1183_v49 = vpop.permute.xlu1 %1182  ;;  %v2259_v51 = vpop.permute.xlu0 %913 }
  0xd6   : > { %v833_v48 = vpop.f32.mrf.mxu0  ;;  %vm1201_vm5 = vcmp.eq.s32.totalorder %v2255_v47, %v1183_v49 }
  0xd7   : > { %v834_v50 = vadd.f32 %v833_v48, %v754_v32  ;;  %vm1697_vm6 = vmpackc.low %vm1202_vm4, %vm1201_vm5  ;;  %v1153_v29 = vpop.permute.xlu2 %1152  ;;  %v924_v32 = vmul.f32 %v2271_v7, %v923_v24  ;;  %v1872_v48 = vpop.eup %1871  ;;  %v686_v24 = vstv %s1644_s30 }
  0xd8   : > { %1698 = vmatpush.bf16.msk.msrb.mxu0 %vm1697_vm6, %v1977_v54  ;;  %1793 = vmatpush.bf16.msk.msra.mxu2 %vm1697_vm6, %v1977_v54  ;;  %vm1191_vm4 = vcmp.eq.s32.totalorder %v2255_v47, %v1153_v29  ;;  %v932_v60 = vmul.f32 0.6931472, %v1872_v48 }
  0xd9   : > { %v853_v55 = vmax.f32 %v834_v50, 0.0  ;;  %v925_v43 = vadd.f32 %v2271_v7, %v924_v32 }
  0xdb   : > { %v869_v63 = vmul.f32 %v1775_v56, %v853_v55  ;;  %v916_v56 = vperm.slane %v2259_v51, 0 }
  0xdc   : > { %v838_v57 = vpop.f32.mrf.mxu3 }
  0xdd   : > { %v839_v58 = vadd.f32 %v838_v57, %v764_v41  ;;  %v1180_v62 = vpop.permute.xlu1 %1179  ;;  %v1177_v2 = vpop.permute.xlu0 %1176  ;;  %v897_v8 = vmul.f32 %v880_v36, %v869_v63  ;;  %v927_v57 = vsel %vm926_vm3, %v2271_v7, %v925_v43 }
  0xde   : > { %v835_v61 = vpop.f32.mrf.mxu0  ;;  %vm1200_vm7 = vcmp.eq.s32.totalorder %v2255_v47, %v1180_v62  ;;  %vm1199_vm8 = vcmp.eq.s32.totalorder %v2255_v47, %v1177_v2 }
  0xdf   : > { %v836_v0 = vadd.f32 %v835_v61, %v759_v33  ;;  %v855_v3 = vmax.f32 %v839_v58, 0.0  ;;  %vm1699_vm9 = vmpackc.low %vm1200_vm7, %vm1199_vm8  ;;  %v936_v33 = vmul.f32 0.66, %v1868_v26  ;;  %v1150_v55 = vpop.permute.xlu2 %1149 }
  0xe0   : > { %1700 = vmatpush.bf16.msk.msrb.mxu0 %vm1699_vm9, %v1977_v54  ;;  %1794 = vmatpush.bf16.msk.msra.mxu2 %vm1699_vm9, %v1977_v54  ;;  %vm1190_vm7 = vcmp.eq.s32.totalorder %v2255_v47, %v1150_v55  ;;  %vm940_vm9 = vweird.f32 %v1868_v26 }
  0xe1   : > { %v854_v5 = vmax.f32 %v836_v0, 0.0  ;;  %v871_v12 = vmul.f32 %v1779_v4, %v855_v3  ;;  %v937_v44 = vsub.f32 1.0, %v936_v33  ;;  %v928_v0 = vmul.f32 %v927_v57, %v920_v52 }
  0xe2   : > { %v933_v3 = vmul.f32 %v932_v60, %v927_v57 }
  0xe3   : > { %v870_v9 = vmul.f32 %v1776_v1, %v854_v5  ;;  %v899_v22 = vmul.f32 %v890_v45, %v871_v12  ;;  %v938_v58 = vmul.f32 %v1868_v26, %v937_v44 }
  0xe4   : > { %v840_v10 = vpop.f32.mrf.mxu3 }
  0xe5   : > { %v898_v13 = vmul.f32 %v885_v46, %v870_v9  ;;  %v841_v14 = vadd.f32 %v840_v10, %v769_v40  ;;  %v1165_v17 = vpop.permute.xlu1 %1164  ;;  %v1174_v21 = vpop.permute.xlu0 %1173  ;;  %v939_v1 = vadd.f32 %v1868_v26, %v938_v58 }
  0xe6   : > { %vm1195_vm11 = vcmp.eq.s32.totalorder %v2255_v47, %v1165_v17  ;;  %vm1198_vm12 = vcmp.eq.s32.totalorder %v2255_v47, %v1174_v21 }
  0xe7   : > { %v901_v18 = vadd.f32 %v898_v13, %v897_v8  ;;  %v856_v19 = vmax.f32 %v841_v14, 0.0  ;;  %vm1701_vm14 = vmpackc.low %vm1198_vm12, %vm1197_vm10  ;;  %v941_v7 = vsel %vm940_vm9, %v1868_v26, %v939_v1  ;;  %v1141_v14 = vpop.permute.xlu2 %1140  ;;  %v687_v26 = vadd.s32 %v686_v24, %v2255_v47 }
  0xe8   : > { %1702 = vmatpush.bf16.msk.msrb.mxu0 %vm1701_vm14, %v1977_v54  ;;  %1795 = vmatpush.bf16.msk.msra.mxu2 %vm1701_vm14, %v1977_v54  ;;  %vm1703_vm15 = vmpackc.low %vm1196_vm13, %vm1195_vm11  ;;  %vm1187_vm11 = vcmp.eq.s32.totalorder %v2255_v47, %v1141_v14  ;;  %vm1057_vm14 = vcmask 261120  }
  0xe9   : > { %v872_v23 = vmul.f32 %v1780_v11, %v856_v19  ;;  %v902_v28 = vadd.f32 %v901_v18, %v899_v22 }
  0xeb   : > { %v900_v27 = vmul.f32 %v2250_v39, %v872_v23  ;;  %v1739_v23 = vld [vmem:[%s2443_s9] sm:$0xff] }
  0xec   : > { %v843_v30 = vpop.f32.mrf.mxu3  ;;  %1704 = vmatpush.bf16.msk.msrb.mxu0 %vm1703_vm15, %v1977_v54  ;;  %1796 = vmatpush.bf16.msk.msra.mxu2 %vm1703_vm15, %v1977_v54  ;;  %vm688_vm15 = vcmp.lt.s32.totalorder %v687_v26, 300 }
  0xed   : > { %v903_v31 = vadd.f32 %v902_v28, %v900_v27  ;;  %v1162_v36 = vpop.permute.xlu1 %1161  ;;  %v1159_v41 = vpop.permute.xlu0 %1158  ;;  %v844_v46 = vadd.f32 %v843_v30, %v2244_v35 }
  0xee   : > { %vm1194_vm0 = vcmp.eq.s32.totalorder %v2255_v47, %v1162_v36  ;;  %vm1193_vm1 = vcmp.eq.s32.totalorder %v2255_v47, %v1159_v41 }
  0xef   : > { %v904_v40 = vrot.slane %v903_v31, 4  ;;  %vm1705_vm2 = vmpackc.low %vm1194_vm0, %vm1193_vm1  ;;  %v857_v61 = vmax.f32 %v844_v46, 0.0 }
  0xf0   : > { %1706 = vmatpush.bf16.msk.msrb.mxu0 %vm1705_vm2, %v1977_v54  ;;  %1797 = vmatpush.bf16.msk.msra.mxu2 %vm1705_vm2, %v1977_v54 }
  0xf1   : > { %v905_v39 = vadd.f32 %v904_v40, %v903_v31  ;;  %v1980_v40 = vmov 0.0  }
  0xf2   : > { %v1645_v41 = vsel %vm688_vm15, 1.0, %v1980_v40 }
  0xf3   : > { %v906_v45 = vrot.slane %v905_v39, 2 }
  0xf4   : > { %v845_v49 = vpop.f32.mrf.mxu3 }
  0xf5   : > { %v907_v50 = vadd.f32 %v906_v45, %v905_v39  ;;  %v846_v53 = vadd.f32 %v845_v49, %v2248_v38  ;;  %v1147_v63 = vpop.permute.xlu1 %1146  ;;  %v1156_v35 = vpop.permute.xlu0 %1155 }
  0xf6   : > { %vm1189_vm5 = vcmp.eq.s32.totalorder %v2255_v47, %v1147_v63  ;;  %vm1192_vm6 = vcmp.eq.s32.totalorder %v2255_v47, %v1156_v35 }
  0xf7   : > { %v908_v59 = vrot.slane %v907_v50, 1  ;;  %v858_v62 = vmax.f32 %v846_v53, 0.0  ;;  %vm1707_vm8 = vmpackc.low %vm1192_vm6, %vm1191_vm4 }
  0xf8   : > { %1708 = vmatpush.bf16.msk.msrb.mxu0 %vm1707_vm8, %v1977_v54  ;;  %1798 = vmatpush.bf16.msk.msra.mxu2 %vm1707_vm8, %v1977_v54  ;;  %vm1709_vm10 = vmpackc.low %vm1190_vm7, %vm1189_vm5  ;;  %vm992_vm5 = vcmask 1040384  }
  0xf9   : > { %v909_v38 = vadd.f32 %v908_v59, %v907_v50  ;;  %v1012_v51 = vpack.c.bf16 %v858_v62, %v857_v61  ;;  %v1011_v62 = vld [vmem:[%s2443_s9 + $0x10] sm:$0x1] }
  0xfa   : > { %v1053_v63 = vunpack.c.l.b16 %v1011_v62 }
  0xfb   : > { %v917_v2 = vadd.f32 %v916_v56, %v909_v38  ;;  %v1740_v56 = vld [vmem:[%s2443_s9 + $0x8] sm:$0xff] }
  0xfc   : > { %v848_v4 = vpop.f32.mrf.mxu3  ;;  %1710 = vmatpush.bf16.msk.msrb.mxu0 %vm1709_vm10, %v1977_v54  ;;  %1799 = vmatpush.bf16.msk.msra.mxu2 %vm1709_vm10, %v1977_v54  ;;  %v1056_v38 = vpack.c.b16 %v1053_v63, %v1053_v63  ;;  %vm1005_vm10 = vcmask 0  }
  0xfd   : > { %v929_v5 = vadd.f32 %v928_v0, %v917_v2  ;;  %v1668_v6 = vadd.f32 2.2832248, %v917_v2  ;;  %v2307_v10 = vpop.permute.xlu0 %1031  ;;  %v849_v13 = vadd.f32 %v848_v4, %v2242_v34  ;;  %v1037_v0 = vpop.permute.xlu1 %1036 }
  0xff   : > { %v934_v8 = vsub.f32 %v929_v5, %v933_v3  ;;  %v1669_v9 = vmul.f32 -1.442695, %v1668_v6  ;;  %v859_v18 = vmax.f32 %v849_v13, 0.0  ;;  %v1022_v5 = vpop.permute.xlu2 %1021 }
 0x101   : > { %v942_v11 = vmul.f32 %v941_v7, %v934_v8  ;;  %1873 = vpow2.f32 %v1669_v9 }
 0x103   : > { %v1666_v12 = vmul.f32 -1.442695, %v942_v11 }
 0x104   : > { %v850_v15 = vpop.f32.mrf.mxu3 }
 0x105   : > { %1875 = vpow2.f32 %v1666_v12  ;;  %v851_v16 = vadd.f32 %v850_v15, %v2246_v37  ;;  %v1144_v20 = vpop.permute.xlu0 %1143 }
 0x106   : > { %vm1188_vm12 = vcmp.eq.s32.totalorder %v2255_v47, %v1144_v20 }
 0x107   : > { %v1874_v17 = vpop.eup %1873  ;;  %v860_v19 = vmax.f32 %v851_v16, 0.0  ;;  %vm1711_vm13 = vmpackc.low %vm1188_vm12, %vm1187_vm11  ;;  %vm1283_vm11 = vcmask 253952  }
 0x108   : > { %v974_v21 = vadd.f32 1.0, %v1874_v17  ;;  %1712 = vmatpush.bf16.msk.msrb.mxu0 %vm1711_vm13, %v1977_v54  ;;  %1800 = vmatpush.bf16.msk.msra.mxu2 %vm1711_vm13, %v1977_v54 }
 0x109   : > { %v1013_v22 = vpack.c.bf16 %v860_v19, %v859_v18 }
 0x10a   : > { %1877 = vrcp.f32 %v974_v21  ;;  %v984_v29 = vand.u32 2147483647, %v974_v21  ;;  %v986_v30 = vand.u32 2147483648, %v974_v21  ;;  %vm980_vm1 = vweird.f32 %v974_v21 }
 0x10b   : > { %v1876_v34 = vpop.eup %1875  ;;  %1073 = vmatpush.bf16.msra.mxu1 %v1013_v22 }
 0x10c   : > { %v946_v37 = vadd.f32 1.0, %v1876_v34  ;;  %vm985_vm3 = vcmp.eq.f32.partialorder %v984_v29, 8.507059e+37  ;;  %v987_v42 = vor.u32 1.1754944e-38, %v986_v30  ;;  %v990_v29 = vld [vmem:[#allocation3] sm:$0x1] }
 0x10d   : > { %v1027_v8 = vpop.permute.xlu0 %1026 }
 0x10e   : > { %1879 = vrcp.f32 %v946_v37  ;;  %v958_v39 = vand.u32 2147483648, %v946_v37  ;;  %v956_v44 = vand.u32 2147483647, %v946_v37  ;;  %vm952_vm6 = vweird.f32 %v946_v37 }
 0x10f   : > { %1074 = vmatpush.bf16.msra.mxu1 %v1012_v51  ;;  %v1042_v51 = vpop.permute.xlu1 %1041 }
 0x110   : > { %v1878_v25 = vpop.eup %1877  ;;  %v959_v50 = vor.u32 1.1754944e-38, %v958_v39  ;;  %vm957_vm8 = vcmp.eq.f32.partialorder %v956_v44, 8.507059e+37  ;;  %v1245_v39 = vld [vmem:[#allocation2 + $0x10] sm:$0xff]  ;;  %v1246_v44 = vld [vmem:[#allocation2 + $0x18] sm:$0xff] }
 0x111   : > { %v976_v27 = vmul.f32 %v1878_v25, %v974_v21  ;;  %vm981_vm0 = vweird.f32 %v1878_v25 }
 0x112   : > { %1678 = vmatmul.msk.bf16.vlgmr.msra.gmra.mxu1 %vm1057_vm14, %v1739_v23  ;;  %vm982_vm2 = vmor %vm980_vm1, %vm981_vm0 }
 0x113   : > { %v977_v54 = vsub.f32 1.0, %v976_v27 }
 0x114   : > { %v1880_v28 = vpop.eup %1879 }
 0x115   : > { %v948_v31 = vmul.f32 %v1880_v28, %v946_v37  ;;  %v978_v32 = vmul.f32 %v1878_v25, %v977_v54  ;;  %vm953_vm4 = vweird.f32 %v1880_v28 }
 0x116   : > { %vm954_vm7 = vmor %vm952_vm6, %vm953_vm4 }
 0x117   : > { %v949_v33 = vsub.f32 1.0, %v948_v31  ;;  %v979_v36 = vadd.f32 %v1878_v25, %v978_v32 }
 0x119   : > { %v950_v43 = vmul.f32 %v1880_v28, %v949_v33  ;;  %v983_v45 = vsel %vm982_vm2, %v1878_v25, %v979_v36  ;;  %v1244_v36 = vld [vmem:[#allocation2 + $0x8] sm:$0xff] }
 0x11a   : > { %v988_v46 = vsel %vm985_vm3, %v987_v42, %v983_v45 }
 0x11b   : > { %v951_v48 = vadd.f32 %v1880_v28, %v950_v43  ;;  %v991_v49 = vmul.f32 %v1645_v41, %v988_v46 }
 0x11d   : > { %v955_v52 = vsel %vm954_vm7, %v1880_v28, %v951_v48  ;;  %v993_v53 = vsel %vm992_vm5, %v991_v49, 0.0  ;;  %v1247_v48 = vld [vmem:[#allocation2 + $0x20] sm:$0x1] }
 0x11e   : > { %v960_v55 = vsel %vm957_vm8, %v959_v50, %v955_v52  ;;  %994 = vadd.xlane.f32.xlu1 %v993_v53 }
 0x11f   : > { %v962_v57 = vmul.f32 1.2, %v960_v55 }
 0x121   : > { %v963_v58 = vadd.f32 -0.1, %v962_v57 }
 0x122   : > { %1679 = vmatmul.msk.bf16.gmra.mxu1 %vm1057_vm14, %v1740_v56 }
 0x123   : > { %v964_v59 = vmax.f32 %v963_v58, 0.0 }
 0x125   : > { %v965_v60 = vmin.f32 %v964_v59, 1.0 }
 0x127   : > { %v966_v61 = vmul.f32 %v1645_v41, %v965_v60 }
 0x129   : > { %vm967_vm9 = vcmp.gt.f32.partialorder %v966_v61, 0.0  ;;  %v1111_v11 = vperm.slane %v966_v61, 0 }
 0x12a   : > { %v1667_v35 = vsel %vm967_vm9, 1.0, %v1980_v40 }
 0x12b   : > { %v1112_v26 = vperm.slane %v1667_v35, 0 }
 0x132   : > { %1680 = vmatmul.msk.bf16.gmra.mxu1 %vm1057_vm14, %v1056_v38 }
 0x18f   : > { %v1076_v1 = vpop.f32.mrf.mxu1 }
 0x190   : > { %v1077_v6 = vadd.f32 %v1076_v1, %v1022_v5 }
 0x191   : > { %v995_v2 = vpop.xlane.xlu1 %994 }
 0x192   : > { %v996_v3 = vrot.slane %v995_v2, 4  ;;  %v1118_v14 = vmul.f32 %v1111_v11, %v1077_v6 }
 0x194   : > { %v997_v4 = vadd.f32 %v996_v3, %v995_v2 }
 0x196   : > { %v998_v7 = vrot.slane %v997_v4, 2 }
 0x197   : > { %v1078_v9 = vpop.f32.mrf.mxu1 }
 0x198   : > { %v1079_v12 = vadd.f32 %v1078_v9, %v1027_v8  ;;  %v999_v13 = vadd.f32 %v998_v7, %v997_v4 }
 0x19a   : > { %v1119_v15 = vmul.f32 %v1111_v11, %v1079_v12  ;;  %v1000_v16 = vrot.slane %v999_v13, 1 }
 0x19c   : > { %v1001_v17 = vadd.f32 %v1000_v16, %v999_v13  ;;  %v1248_v18 = vpack.c.bf16 %v1119_v15, %v1118_v14 }
 0x19e   : > { %1809 = vpush %v1001_v17  ;;  %1259 = vmatmul.bf16.vlgmr.msrb.gmra.mxu0 %v1248_v18 }
 0x19f   : > { %v1081_v19 = vpop.f32.mrf.mxu1 }
 0x1a0   : > { %v1082_v20 = vadd.f32 %v1081_v19, %v2307_v10  ;;  %v1243_v10 = vld [vmem:[#allocation2] sm:$0xff] }
 0x1a2   : > { %v1120_v34 = vmul.f32 %v1111_v11, %v1082_v20 }
 0x1a7   : > { %v1083_v21 = vpop.f32.mrf.mxu1 }
 0x1a8   : > { %v1084_v22 = vadd.f32 %v1083_v21, %v1037_v0 }
 0x1aa   : > { %v1121_v37 = vmul.f32 %v1111_v11, %v1084_v22 }
 0x1ac   : > { %v1249_v23 = vpack.c.bf16 %v1121_v37, %v1120_v34 }
 0x1ae   : > { %1264 = vmatmul.bf16.vlgmr.msra.gmra.mxu2 %v1249_v23 }
 0x1af   : > { %v1086_v24 = vpop.f32.mrf.mxu1 }
 0x1b0   : > { %v1087_v25 = vadd.f32 %v1086_v24, %v1042_v51 }
 0x1b2   : > { %v1122_v54 = vmul.f32 %v1112_v26, %v1087_v25 }
 0x1b4   : > { %v1250_v28 = vpack.c.bf16 %v1122_v54, %v1122_v54 }
 0x1b7   : > { %v1088_v27 = vpop.f32.mrf.mxu1 }
 0x1be   : > { %1269 = vmatmul.bf16.gmra.mxu2 %v1250_v28 }
 0x1cf   : > { %s1810_s25 = spop %1809 }
 0x1d0   : > { %v1003_v30 = vstv %s1810_s25 }
 0x1d1   : > { %v1004_v31 = vadd.f32 %v1003_v30, %v990_v29 }
 0x1d3   : > { %1006 = vst.msk [vmem:[#allocation3] sm:$0x1] %vm1005_vm10, %v1004_v31 }
 0x21b   : > { %v1260_v32 = vpop.f32.mrf.mxu0 }
 0x21c   : > { %v1274_v33 = vadd.f32 %v1260_v32, %v1243_v10 }
 0x21e   : > { %1279 = vst.msk [vmem:[#allocation2] sm:$0xff] %vm1057_vm14, %v1274_v33 }
 0x223   : > { %v1262_v40 = vpop.f32.mrf.mxu0 }
 0x224   : > { %v1275_v41 = vadd.f32 %v1262_v40, %v1244_v36 }
 0x226   : > { %1280 = vst.msk [vmem:[#allocation2 + $0x8] sm:$0xff] %vm1057_vm14, %v1275_v41 }
 0x231   : > { %v1265_v42 = vpop.f32.mrf.mxu2 }
 0x232   : > { %v1276_v43 = vadd.f32 %v1265_v42, %v1245_v39 }
 0x234   : > { %1281 = vst.msk [vmem:[#allocation2 + $0x10] sm:$0xff] %vm1057_vm14, %v1276_v43 }
 0x239   : > { %v1267_v45 = vpop.f32.mrf.mxu2 }
 0x23a   : > { %v1277_v46 = vadd.f32 %v1267_v45, %v1246_v44 }
 0x23c   : > { %1282 = vst.msk [vmem:[#allocation2 + $0x18] sm:$0xff] %vm1057_vm14, %v1277_v46 }
 0x241   : > { %v1270_v49 = vpop.f32.mrf.mxu2 }
 0x242   : > { %v1278_v50 = vadd.f32 %v1270_v49, %v1247_v48 }
 0x244   : > { %1284 = vst.msk [vmem:[#allocation2 + $0x20] sm:$0x1] %vm1283_vm11, %v1278_v50 }
 0x245   : > { %1288 = sbr.rel (%p1713_p11) target bundleno = 998 (0x3e6), region = 162 }
 0x249   : > { %v1272_v52 = vpop.f32.mrf.mxu2 }
 0x24a   : > { %v1356_v53 = vld [vmem:[%s2438_s4 + $0x18] sm:$0xff]  ;;  %v1354_v55 = vld [vmem:[%s2438_s4 + $0x8] sm:$0xff]  ;;  %v1981_v56 = vmov 0   ;;  %v1355_v59 = vld [vmem:[%s2438_s4 + $0x10] sm:$0xff]  ;;  %v1982_v5 = vmov 0.0   ;;  %v1983_v36 = vmov 1.0  }
 0x24b   : > { %1882 = vset.pattern.permute.xlu1 %v1981_v56  ;;  %1881 = vset.pattern.permute.xlu0 %v1981_v56  ;;  %v1293_v57 = vld [vmem:[#allocation2 + $0x20] sm:$0x1]  ;;  %v1495_v61 = vld [vmem:[#allocation3] sm:$0x1]  ;;  %v1291_v11 = vld [vmem:[#allocation2 + $0x10] sm:$0xff]  ;;  %vm1422_vm6 = vcmask 31744  }
 0x24c   : > { %1367 = vperm.xlu0 %1881, %v1356_v53   ;;  %1361 = vperm.xlu1 %1882, %v1354_v55   ;;  %v1294_v58 = vmax.f32 %v1293_v57, 1.0  ;;  %v1353_v60 = vld [vmem:[%s2438_s4] sm:$0xff]  ;;  %v1496_v35 = vmul.f32 0.0033333334, %v1495_v61  ;;  %vm1315_vm15 = vcmp.gt.f32.partialorder %v1293_v57, 0.0  ;;  %v1290_v9 = vld [vmem:[#allocation2 + $0x8] sm:$0xff] }
 0x24d   : > { %v1464_v0 = vld [vmem:[%s2446_s12] sm:$0x3]  ;;  %v1714_v6 = vsel %vm1315_vm15, 1.0, %v1982_v5  ;;  %v1292_v12 = vld [vmem:[#allocation2 + $0x18] sm:$0xff]  ;;  %v1343_v10 = vsel %vm1283_vm11, %v1293_v57, 0.0  ;;  %vm1505_vm7 = vcmp.eq.s32.totalorder %v2255_v47, 1 }
 0x24e   : > { %1883 = vrcp.f32 %v1294_v58  ;;  %v1306_v38 = vand.u32 2147483648, %v1294_v58  ;;  %vm1300_vm12 = vweird.f32 %v1294_v58  ;;  %v1304_v1 = vand.u32 2147483647, %v1294_v58  ;;  %v1289_v7 = vld [vmem:[#allocation2] sm:$0xff] }
 0x24f   : > { %v1318_v15 = vperm.slane %v1714_v6, 0  ;;  %vm1497_vm8 = vcmp.eq.s32.totalorder %v2255_v47, 0  ;;  %vm1509_vm9 = vcmp.eq.s32.totalorder %v2255_v47, 2 }
 0x250   : > { %v1307_v3 = vor.u32 1.1754944e-38, %v1306_v38  ;;  %vm1305_vm1 = vcmp.eq.f32.partialorder %v1304_v1, 8.507059e+37 }
 0x254   : > { %1364 = vperm.xlu0 %1881, %v1355_v59   ;;  %1358 = vperm.xlu1 %1882, %v1353_v60   ;;  %v1884_v62 = vpop.eup %1883 }
 0x255   : > { %v1296_v63 = vmul.f32 %v1884_v62, %v1294_v58  ;;  %vm1301_vm13 = vweird.f32 %v1884_v62 }
 0x256   : > { %vm1302_vm0 = vmor %vm1300_vm12, %vm1301_vm13 }
 0x257   : > { %v1297_v51 = vsub.f32 1.0, %v1296_v63 }
 0x259   : > { %v1298_v2 = vmul.f32 %v1884_v62, %v1297_v51 }
 0x25b   : > { %v1299_v4 = vadd.f32 %v1884_v62, %v1298_v2 }
 0x25c   : > { %1500 = vperm.xlu0 %1881, %v1496_v35   ;;  %1467 = vperm.xlu1 %1882, %v1464_v0  }
 0x25d   : > { %v1303_v8 = vsel %vm1302_vm0, %v1884_v62, %v1299_v4  ;;  %vm1493_vm0 = vcmask 25600  }
 0x25e   : > { %v1308_v13 = vsel %vm1305_vm1, %v1307_v3, %v1303_v8 }
 0x25f   : > { %v1310_v14 = vperm.slane %v1308_v13, 0 }
 0x261   : > { %v1311_v16 = vmul.f32 %v1310_v14, %v1289_v7  ;;  %v1312_v17 = vmul.f32 %v1310_v14, %v1290_v9  ;;  %v1313_v18 = vmul.f32 %v1310_v14, %v1291_v11  ;;  %v1314_v19 = vmul.f32 %v1310_v14, %v1292_v12 }
 0x263   : > { %v1319_v20 = vmul.f32 %v1318_v15, %v1311_v16  ;;  %v1320_v21 = vmul.f32 %v1318_v15, %v1312_v17  ;;  %v1321_v22 = vmul.f32 %v1318_v15, %v1313_v18  ;;  %v1322_v34 = vmul.f32 %v1318_v15, %v1314_v19 }
 0x265   : > { %v1323_v37 = vmul.f32 %v1319_v20, %v1319_v20  ;;  %v1324_v23 = vmul.f32 %v1320_v21, %v1320_v21  ;;  %v1325_v24 = vmul.f32 %v1321_v22, %v1321_v22  ;;  %v1326_v25 = vmul.f32 %v1322_v34, %v1322_v34 }
 0x267   : > { %v1327_v26 = vsel %vm1057_vm14, %v1323_v37, 0.0  ;;  %v1328_v27 = vsel %vm1057_vm14, %v1324_v23, 0.0  ;;  %v1330_v54 = vsel %vm1057_vm14, %v1325_v24, 0.0  ;;  %v1332_v29 = vsel %vm1057_vm14, %v1326_v25, 0.0 }
 0x268   : > { %v1329_v28 = vadd.f32 %v1328_v27, %v1327_v26 }
 0x26a   : > { %v1331_v30 = vadd.f32 %v1330_v54, %v1329_v28 }
 0x26c   : > { %v1333_v31 = vadd.f32 %v1332_v29, %v1331_v30 }
 0x26e   : > { %1334 = vadd.xlane.f32.xlu2 %v1333_v31 }
 0x276   : > { %1344 = vadd.xlane.f32.xlu2 %v1343_v10 }
 0x2be   : > { %v1368_v32 = vpop.permute.xlu0 %1367  ;;  %v1362_v33 = vpop.permute.xlu1 %1361 }
 0x2bf   : > { %vm1372_vm2 = vcmp.eq.s32.totalorder %v2255_v47, %v1368_v32  ;;  %vm1370_vm3 = vcmp.eq.s32.totalorder %v2255_v47, %v1362_v33 }
 0x2c0   : > { %1719 = vmatpush.msk.msra.mxu0 %vm1372_vm2, %v1983_v36  ;;  %1801 = vmatpush.msk.msra.mxu2 %vm1372_vm2, %v1983_v36  ;;  %v1716_v40 = vsel %vm1370_vm3, 1.0, %v1982_v5  ;;  %v1718_v46 = vsel %vm1372_vm2, 1.0, %v1982_v5 }
 0x2c1   : > { %1802 = vmatpush.msk.msra.mxu3 %vm1372_vm2, %v1983_v36  ;;  %v1424_v44 = vsel %vm1422_vm6, %v1716_v40, 0.0  ;;  %v1428_v52 = vsel %vm1422_vm6, %v1718_v46, 0.0 }
 0x2c6   : > { %v1365_v41 = vpop.permute.xlu0 %1364  ;;  %v1359_v39 = vpop.permute.xlu1 %1358 }
 0x2c7   : > { %vm1371_vm4 = vcmp.eq.s32.totalorder %v2255_v47, %v1365_v41  ;;  %vm1369_vm5 = vcmp.eq.s32.totalorder %v2255_v47, %v1359_v39 }
 0x2c8   : > { %v1717_v42 = vsel %vm1371_vm4, 1.0, %v1982_v5  ;;  %v1715_v43 = vsel %vm1369_vm5, 1.0, %v1982_v5  ;;  %1720 = vmatpush.msk.msra.mxu0 %vm1371_vm4, %v1983_v36  ;;  %1803 = vmatpush.msk.msra.mxu2 %vm1371_vm4, %v1983_v36 }
 0x2c9   : > { %v1423_v45 = vsel %vm1422_vm6, %v1715_v43, 0.0  ;;  %1804 = vmatpush.msk.msra.mxu3 %vm1371_vm4, %v1983_v36  ;;  %v1426_v49 = vsel %vm1422_vm6, %v1717_v42, 0.0  ;;  %v1463_v42 = vld [vmem:[%s2445_s11] sm:$0x3] }
 0x2ca   : > { %v1425_v48 = vadd.f32 %v1424_v44, %v1423_v45  ;;  %1721 = vmatpush.msk.msra.mxu0 %vm1370_vm3, %v1983_v36  ;;  %1805 = vmatpush.msk.msra.mxu2 %vm1370_vm3, %v1983_v36 }
 0x2cb   : > { %1806 = vmatpush.msk.msra.mxu3 %vm1370_vm3, %v1983_v36 }
 0x2cc   : > { %v1427_v50 = vadd.f32 %v1426_v49, %v1425_v48  ;;  %1722 = vmatpush.msk.msra.mxu0 %vm1369_vm5, %v1983_v36  ;;  %1807 = vmatpush.msk.msra.mxu2 %vm1369_vm5, %v1983_v36 }
 0x2cd   : > { %1808 = vmatpush.msk.msra.mxu3 %vm1369_vm5, %v1983_v36  ;;  %1723 = vmatmul.msk.f32.vlgmr.msra.gmra.mxu0 %vm1057_vm14, %v1319_v20 }
 0x2ce   : > { %v1429_v53 = vadd.f32 %v1428_v52, %v1427_v50  ;;  %1724 = vmatmul.msk.f32.vlgmr.msra.gmra.mxu2 %vm1057_vm14, %v1320_v21  ;;  %1725 = vmatmul.msk.f32.vlgmr.msra.gmra.mxu3 %vm1057_vm14, %v1321_v22  ;;  %v1501_v3 = vpop.permute.xlu0 %1500  ;;  %v1468_v43 = vpop.permute.xlu1 %1467 }
 0x2cf   : > { %v1503_v7 = vperm.slane %v1501_v3, 0 }
 0x2d0   : > { %v1430_v2 = vrot.slane %v1429_v53, 4 }
 0x2d1   : > { %v1504_v11 = vsel %vm1497_vm8, %v1503_v7, 0.0 }
 0x2d2   : > { %v1431_v6 = vadd.f32 %v1430_v2, %v1429_v53 }
 0x2d4   : > { %v1432_v9 = vrot.slane %v1431_v6, 2 }
 0x2d6   : > { %1726 = vmatmul.msk.f32.gmra.mxu3 %vm1057_vm14, %v1322_v34  ;;  %v1433_v16 = vadd.f32 %v1432_v9, %v1431_v6 }
 0x2d8   : > { %v1434_v17 = vrot.slane %v1433_v16, 1 }
 0x2da   : > { %v1435_v18 = vadd.f32 %v1434_v17, %v1433_v16 }
 0x2dc   : > { %v1436_v19 = vmax.f32 %v1435_v18, 1.0  ;;  %vm1456_vm15 = vcmp.gt.f32.partialorder %v1435_v18, 0.0 }
 0x2dd   : > { %v1727_v10 = vsel %vm1456_vm15, 1.0, %v1982_v5 }
 0x2de   : > { %1885 = vrcp.f32 %v1436_v19  ;;  %v1448_v47 = vand.u32 2147483648, %v1436_v19  ;;  %vm1442_vm11 = vweird.f32 %v1436_v19  ;;  %v1446_v24 = vand.u32 2147483647, %v1436_v19 }
 0x2e0   : > { %v1449_v26 = vor.u32 1.1754944e-38, %v1448_v47  ;;  %vm1447_vm13 = vcmp.eq.f32.partialorder %v1446_v24, 8.507059e+37 }
 0x2e1   : > { %v1335_v55 = vpop.xlane.xlu2 %1334 }
 0x2e2   : > { %v1336_v56 = vrot.slane %v1335_v55, 4 }
 0x2e4   : > { %v1337_v57 = vadd.f32 %v1336_v56, %v1335_v55  ;;  %v1886_v20 = vpop.eup %1885 }
 0x2e5   : > { %v1438_v21 = vmul.f32 %v1886_v20, %v1436_v19  ;;  %vm1443_vm10 = vweird.f32 %v1886_v20 }
 0x2e6   : > { %v1338_v58 = vrot.slane %v1337_v57, 2  ;;  %vm1444_vm12 = vmor %vm1442_vm11, %vm1443_vm10 }
 0x2e7   : > { %v1439_v22 = vsub.f32 1.0, %v1438_v21 }
 0x2e8   : > { %v1339_v59 = vadd.f32 %v1338_v58, %v1337_v57 }
 0x2e9   : > { %v1345_v60 = vpop.xlane.xlu2 %1344  ;;  %v1440_v34 = vmul.f32 %v1886_v20, %v1439_v22 }
 0x2ea   : > { %v1346_v61 = vrot.slane %v1345_v60, 4  ;;  %v1340_v62 = vrot.slane %v1339_v59, 1 }
 0x2eb   : > { %v1441_v23 = vadd.f32 %v1886_v20, %v1440_v34 }
 0x2ec   : > { %v1347_v63 = vadd.f32 %v1346_v61, %v1345_v60  ;;  %v1341_v35 = vadd.f32 %v1340_v62, %v1339_v59 }
 0x2ed   : > { %v1445_v25 = vsel %vm1444_vm12, %v1886_v20, %v1441_v23 }
 0x2ee   : > { %v1348_v38 = vrot.slane %v1347_v63, 2  ;;  %1811 = vpush %v1341_v35  ;;  %v1450_v27 = vsel %vm1447_vm13, %v1449_v26, %v1445_v25 }
 0x2f0   : > { %v1349_v0 = vadd.f32 %v1348_v38, %v1347_v63 }
 0x2f2   : > { %v1350_v51 = vrot.slane %v1349_v0, 1 }
 0x2f4   : > { %v1351_v1 = vadd.f32 %v1350_v51, %v1349_v0 }
 0x2f6   : > { %1813 = vpush %v1351_v1 }
 0x31f   : > { %s1812_s20 = spop %1811 }
 0x320   : > { %v1506_v4 = vstv %s1812_s20 }
 0x321   : > { %v1507_v8 = vsel %vm1505_vm7, %v1506_v4, 0.0 }
 0x322   : > { %v1508_v12 = vadd.f32 %v1507_v8, %v1504_v11 }
 0x327   : > { %s1814_s24 = spop %1813 }
 0x328   : > { %v1510_v13 = vstv %s1814_s24 }
 0x329   : > { %v1511_v14 = vsel %vm1509_vm9, %v1510_v13, 0.0 }
 0x32a   : > { %v1512_v15 = vadd.f32 %v1511_v14, %v1508_v12 }
 0x32c   : > { %1513 = vst [vmem:[#allocation9] sm:$0x1] %v1512_v15 }
 0x34a   : > { %v1410_v31 = vpop.f32.mrf.mxu0 }
 0x34b   : > { %v1452_v36 = vmul.f32 %v1450_v27, %v1410_v31 }
 0x34d   : > { %v1459_v39 = vmul.f32 %v1727_v10, %v1452_v36 }
 0x351   : > { %v1416_v37 = vpop.f32.mrf.mxu3  ;;  %v1413_v54 = vpop.f32.mrf.mxu2 }
 0x352   : > { %v1454_v29 = vmul.f32 %v1450_v27, %v1416_v37  ;;  %v1453_v32 = vmul.f32 %v1450_v27, %v1413_v54 }
 0x354   : > { %v1461_v40 = vmul.f32 %v1727_v10, %v1454_v29  ;;  %v1460_v41 = vmul.f32 %v1727_v10, %v1453_v32 }
 0x359   : > { %v1419_v28 = vpop.f32.mrf.mxu3 }
 0x35a   : > { %v1455_v30 = vmul.f32 %v1450_v27, %v1419_v28 }
 0x35c   : > { %v1462_v33 = vmul.f32 %v1727_v10, %v1455_v30 }
 0x35e   : > { %1485 = vmatpush.msra.mxu1 %v1462_v33 }
 0x360   : > { %1486 = vmatpush.msra.mxu1 %v1461_v40 }
 0x362   : > { %1487 = vmatpush.msra.mxu1 %v1460_v41 }
 0x364   : > { %1488 = vmatpush.msra.mxu1 %v1459_v39 }
 0x365   : > { %1728 = vmatmul.msk.f32.vlgmr.msra.gmra.mxu1 %vm1057_vm14, %v1463_v42 }
 0x3e2   : > { %v1490_v44 = vpop.f32.mrf.mxu1 }
 0x3e3   : > { %v1491_v5 = vadd.f32 %v1490_v44, %v1468_v43 }
 0x3e5   : > { %1494 = vst.msk [vmem:[#allocation7] sm:$0x3] %vm1493_vm0, %v1491_v5 }
 0x3e6 PF: > { %p1823_p12 = scmp.eq.s32.totalorder %s2080_s8, 2  ;;  %s1984_s23 = smov [#allocation7]  }
 0x3e7   : > { %s1520_s19 = sshll.u32 %s1984_s23, 4  ;;  %s1522_s30 = sshll.u32 %s2447_s13, 4  ;;  %s1521_s19 = int_to_ptr.vmem [resolvable:$true] %s1520_s19  ;;  %s1523_s30 = int_to_ptr.hbm [resolvable:$true] %s1522_s30 }
 0x3e8   : > { %1816 = dma.vmem_to_hbm [thread:$0]  (%p1823_p12), %s1521_s19, 32, %s1523_s30, [#allocation8]  }
 0x3e9   : > { %s1534_s26 = sshll.u32 %s2448_s14, 4  ;;  %s1985_s17 = smov [#allocation9]   ;;  %s1535_s26 = int_to_ptr.hbm [resolvable:$true] %s1534_s26 }
 0x3ea   : > { %s1532_s20 = sshll.u32 %s1985_s17, 4  ;;  %s1533_s20 = int_to_ptr.vmem [resolvable:$true] %s1532_s20 }
 0x3eb   : > { %1818 = dma.vmem_to_hbm [thread:$0]  (%p1823_p12), %s1533_s20, 16, %s1535_s26, [#allocation10]  }
 0x3ec   : > { %1956 = dma.done.wait (%p1823_p12), [#allocation8], 32  }
 0x3ed   : > { %1958 = vsyncadd (%p1823_p12), [#allocation8], 4294967264 }
 0x3ee   : > { %1960 = dma.done.wait (%p1823_p12), [#allocation10], 16  }
 0x3ef   : > { %1962 = vsyncadd (%p1823_p12), [#allocation10], 4294967280 }
 0x3f0 PF: > { %p26_p13 = scmp.ge.s32.totalorder %s2083_s18, 5   ;;  %s2450_s15 = smov %s1969_s16 }
 0x3f1   : > { %s2451_s16 = smov %s2092_s21  ;;  %s2452_s17 = smov %s2083_s18 }
 0x3f2   :  { %28 = sbr.rel (!%p26_p13) target bundleno = 6 (0x6), region = 216 }
 0x3f7   :  { %1553 = vsyncpa [#allocation8], 1 }
 0x3f8   :  { %1555 = vsyncpa [#allocation8 + $0x1], 1 }
 0x3f9   :  { %1556 = vsyncpa [#allocation10], 1 }

</bundles_post_ra>
